<compile_context>
chip_gen: v7x
topology: tpu7x:2x2x1
jax: 0.10.0
libtpu: 0.0.40
codegen_flags: <defaults>
</compile_context>

<pallas_src>
import math

import jax
import jax.numpy as jnp
from jax.experimental import pallas as pl
from jax.experimental.pallas import tpu as pltpu


_INV_SQRT2 = 1.0 / math.sqrt(2.0)


def _gelu_exact(x):
    # nn.GELU() default is the exact (erf-based) GELU.
    return 0.5 * x * (1.0 + jax.lax.erf(x * _INV_SQRT2))


def _round_up(v, m):
    return ((v + m - 1) // m) * m


def _shrink_aligned(v, unit):
    """Roughly halve v while keeping it a positive multiple of `unit`."""
    return max(unit, (v // 2 // unit) * unit)


def ffn_kernel(x_ref, w1_ref, b1_ref, w2_ref, b2_ref, o_ref, acc_ref):
    k = pl.program_id(1)

    @pl.when(k == 0)
    def _init():
        acc_ref[...] = jnp.zeros_like(acc_ref)

    # fc1 slice: (tm, ti) -- bf16 x bf16 on the MXU, f32 accumulation.
    h = jnp.dot(x_ref[...], w1_ref[...], preferred_element_type=jnp.float32)
    h = _gelu_exact(h + b1_ref[...])                             # (tm, ti) f32
    # fc2 slice contribution, accumulated over the I axis (back to bf16 for MXU).
    acc_ref[...] += jnp.dot(h.astype(w2_ref.dtype), w2_ref[...],
                            preferred_element_type=jnp.float32)   # (tm, H) f32

    @pl.when(k == pl.num_programs(1) - 1)
    def _finalize():
        o_ref[...] = (acc_ref[...] + b2_ref[...]).astype(o_ref.dtype)


def _chip_config():
    """Per-TPU-generation tile / VMEM defaults."""
    kind = ""
    try:
        kind = (getattr(jax.devices()[0], "device_kind", "") or "").lower()
    except Exception:
        pass
    if "v7" in kind:
        # Only 64 MiB VMEM per TC and 2 TCs/chip -> leave headroom, split rows.
        return dict(tm=512, ti=1024, vmem=52 * 2**20, align=256, split=2)
    if "v6" in kind:
        return dict(tm=640, ti=1024, vmem=104 * 2**20, align=256, split=1)
    if "v5" in kind:
        return dict(tm=256, ti=1024, vmem=64 * 2**20, align=128, split=1)
    # Unknown device: conservative.
    return dict(tm=256, ti=512, vmem=64 * 2**20, align=128, split=1)


def feed_forward(x, w1, b1, w2, b2, *, tm_target=None, ti_target=None,
                 compute_dtype=jnp.bfloat16):
    """fc2(gelu(fc1(x))).  x: (B,S,H); w1: (H,I); b1: (I,); w2: (I,H); b2: (H,).

    Matmuls run in `compute_dtype` (bf16 by default) with f32 accumulation;
    the output keeps x.dtype.
    """
    B, S, H = x.shape
    I = w1.shape[1]
    M = B * S
    out_dtype = x.dtype

    cfg = _chip_config()
    align = cfg["align"]
    vmem_limit = cfg["vmem"]
    tm_target = cfg["tm"] if tm_target is None else tm_target
    ti_target = cfg["ti"] if ti_target is None else ti_target

    # Row tile (M axis): MXU-pass aligned (128 on v5e, 256 on v6e/v7x).
    tm = min(_round_up(tm_target, align), _round_up(M, align))
    # v7x: make sure the "parallel" axis has work for both TensorCores.
    if cfg["split"] > 1 and M > align:
        tm = min(tm, _round_up(-(-M // cfg["split"]), align))
    Mp = _round_up(M, tm)

    # Intermediate tile (I axis, reduction): full I when small, else a
    # 128-aligned slice.
    if I <= ti_target:
        ti, Ip = I, I
    else:
        ti = max(128, (ti_target // 128) * 128)
        Ip = _round_up(I, ti)

    cd = jnp.dtype(compute_dtype).itemsize
    od = jnp.dtype(out_dtype).itemsize

    def _vmem_bytes(tm_, ti_):
        dbuf = 2 * (tm_ * H * cd      # x tile
                    + H * ti_ * cd    # w1 slice
                    + ti_ * H * cd    # w2 slice
                    + tm_ * H * od    # out tile
                    + 8 * ti_ * 4 + 8 * H * 4)   # biases (sublane padded)
        return dbuf + tm_ * H * 4     # f32 accumulator

    # Shrink ti (then tm) until the working set fits comfortably in the limit.
    budget = int(vmem_limit * 0.85)
    while _vmem_bytes(tm, ti) > budget:
        if ti > 256:
            ti = _shrink_aligned(ti, 128)
            Ip = _round_up(I, ti) if I > ti else I
            if I <= ti:
                ti, Ip = I, I
        elif tm > align:
            tm = _shrink_aligned(tm, align)
            Mp = _round_up(M, tm)
        else:
            break  # smallest tiles; rely on the compiler's limit handling

    # Cast to the MXU compute dtype (halves weight/x DMA bytes for bf16).
    x2d = x.reshape(M, H).astype(compute_dtype)
    w1c = w1.astype(compute_dtype)
    w2c = w2.astype(compute_dtype)
    b1f = b1.astype(jnp.float32)
    b2f = b2.astype(jnp.float32)

    if Mp != M:
        x2d = jnp.pad(x2d, ((0, Mp - M), (0, 0)))
    if Ip != I:
        # Zero-padding the intermediate dim is exact: gelu(0 + 0) = 0 and the
        # corresponding zero rows of w2 contribute nothing.
        w1c = jnp.pad(w1c, ((0, 0), (0, Ip - I)))
        b1f = jnp.pad(b1f, ((0, Ip - I),))
        w2c = jnp.pad(w2c, ((0, Ip - I), (0, 0)))
    b1_2d = b1f.reshape(1, Ip)
    b2_2d = b2f.reshape(1, H)

    grid = (Mp // tm, Ip // ti)
    n_row_tiles = grid[0]

    # Advisory cost: weights are re-streamed once per row tile.
    cost = pl.CostEstimate(
        flops=4 * Mp * H * Ip,                      # two matmuls (padded)
        transcendentals=Mp * Ip,                    # erf in GELU
        bytes_accessed=(cd * Mp * H                 # x (padded)
                        + od * Mp * H               # out
                        + n_row_tiles * 2 * H * Ip * cd   # w1+w2 re-streaming
                        + 4 * (Ip + H)),            # biases
    )

    out2d = pl.pallas_call(
        ffn_kernel,
        out_shape=jax.ShapeDtypeStruct((Mp, H), out_dtype),
        grid=grid,
        in_specs=[
            pl.BlockSpec((tm, H), lambda i, k: (i, 0)),   # x row tile
            pl.BlockSpec((H, ti), lambda i, k: (0, k)),   # fc1 weight slice
            pl.BlockSpec((1, ti), lambda i, k: (0, k)),   # fc1 bias slice (f32)
            pl.BlockSpec((ti, H), lambda i, k: (k, 0)),   # fc2 weight slice
            pl.BlockSpec((1, H), lambda i, k: (0, 0)),    # fc2 bias (f32)
        ],
        out_specs=pl.BlockSpec((tm, H), lambda i, k: (i, 0)),
        scratch_shapes=[pltpu.VMEM((tm, H), jnp.float32)],  # f32 accumulator
        compiler_params=pltpu.CompilerParams(
            dimension_semantics=("parallel", "arbitrary"),
            vmem_limit_bytes=vmem_limit,
        ),
        cost_estimate=cost,
    )(x2d, w1c, b1_2d, w2c, b2_2d)

    return out2d[:M].reshape(B, S, H)


def _reference(x, w1, b1, w2, b2):
    hi = jax.lax.Precision.HIGHEST
    h = _gelu_exact(jnp.einsum("bsh,hi->bsi", x, w1, precision=hi) + b1)
    return jnp.einsum("bsi,ih->bsh", h, w2, precision=hi) + b2


if __name__ == "__main__":
    # Small transformer-FFN-like shapes, chosen (with the small tile targets
    # below) so the grid has multiple steps on both the row axis (ragged M,
    # exercising padding) and the intermediate-reduction axis.
    batch, seq, hidden, intermediate = 2, 200, 128, 512

    key = jax.random.PRNGKey(0)
    kx, kw1, kb1, kw2, kb2 = jax.random.split(key, 5)

    x = jax.random.normal(kx, (batch, seq, hidden), dtype=jnp.float32)

    # Deterministic init mimicking nn.Linear's uniform(-1/sqrt(fan_in), +).
    lim1 = 1.0 / math.sqrt(hidden)
    lim2 = 1.0 / math.sqrt(intermediate)
    w1 = jax.random.uniform(kw1, (hidden, intermediate), jnp.float32, -lim1, lim1)
    b1 = jax.random.uniform(kb1, (intermediate,), jnp.float32, -lim1, lim1)
    w2 = jax.random.uniform(kw2, (intermediate, hidden), jnp.float32, -lim2, lim2)
    b2 = jax.random.uniform(kb2, (hidden,), jnp.float32, -lim2, lim2)

    # Small tile targets exercise the (row-tile, I-reduction) pipeline at these
    # toy shapes; production sizes use the per-chip defaults.
    out = feed_forward(x, w1, b1, w2, b2, tm_target=256, ti_target=256)
    out = jax.block_until_ready(out)

    ref = _reference(x, w1, b1, w2, b2)
    assert out.shape == (batch, seq, hidden)
    # bf16 MXU path vs. f32 HIGHEST reference -> loose-but-safe tolerance.
    assert jnp.allclose(out.astype(jnp.float32), ref, atol=3e-2, rtol=3e-2)

    print("KERNEL_OK")
</pallas_src>

<mosaic_0001>
module attributes {stable_mosaic.version = 11 : i64} {
  func.func @ffn_kernel(%arg0: i32, %arg1: i32, %arg2: memref<256x128xbf16, #tpu.memory_space<vmem>>, %arg3: memref<128x256xbf16, #tpu.memory_space<vmem>>, %arg4: memref<1x256xf32, #tpu.memory_space<vmem>>, %arg5: memref<256x128xbf16, #tpu.memory_space<vmem>>, %arg6: memref<1x128xf32, #tpu.memory_space<vmem>>, %arg7: memref<256x128xf32, #tpu.memory_space<vmem>>, %arg8: memref<256x128xf32, #tpu.memory_space<vmem>>) attributes {dimension_semantics = [#tpu.dimension_semantics<parallel>, #tpu.dimension_semantics<arbitrary>], iteration_bounds = array<i64: 2, 2>, scalar_prefetch = 0 : i64, scratch_operands = 1 : i64, tpu.core_type = #tpu.core_type<tc>, window_params = [{transform_indices = @transform_0, window_bounds = array<i64: 256, 128>}, {transform_indices = @transform_1, window_bounds = array<i64: 128, 256>}, {transform_indices = @transform_2, window_bounds = array<i64: 1, 256>}, {transform_indices = @transform_3, window_bounds = array<i64: 256, 128>}, {pipeline_mode = #tpu.pipeline_mode<synchronous>, transform_indices = @transform_4, window_bounds = array<i64: 1, 128>}, {transform_indices = @transform_5, window_bounds = array<i64: 256, 128>}]} {
    %c0_i32 = arith.constant 0 : i32
    %0 = arith.cmpi eq, %arg1, %c0_i32 : i32
    %1 = arith.extui %0 : i1 to i32
    %c0_i32_0 = arith.constant 0 : i32
    %2 = arith.cmpi ne, %1, %c0_i32_0 : i32
    scf.if %2 {
      %cst_17 = arith.constant 0.000000e+00 : f32
      %26 = vector.broadcast %cst_17 : f32 to vector<256x128xf32>
      %c0_18 = arith.constant 0 : index
      %c0_19 = arith.constant 0 : index
      %27 = vector.load %arg8[%c0_18, %c0_19] : memref<256x128xf32, #tpu.memory_space<vmem>>, vector<256x128xf32>
      tpu.vector_store %arg8[%c0_18, %c0_19], %26 {strides = array<i32>} : memref<256x128xf32, #tpu.memory_space<vmem>>, vector<256x128xf32>,
    } else {
    }
    %c0 = arith.constant 0 : index
    %c0_1 = arith.constant 0 : index
    %3 = vector.load %arg2[%c0, %c0_1] : memref<256x128xbf16, #tpu.memory_space<vmem>>, vector<256x128xbf16>
    %c0_2 = arith.constant 0 : index
    %c0_3 = arith.constant 0 : index
    %4 = vector.load %arg3[%c0_2, %c0_3] : memref<128x256xbf16, #tpu.memory_space<vmem>>, vector<128x256xbf16>
    %cst = arith.constant dense<0.000000e+00> : vector<256x256xf32>
    %5 = tpu.matmul %3, %4, %cst {dimension_numbers = #tpu.dot_dimension_numbers<[1], [0], [0], [1], [0, 0, 1, 1], [], []>} : vector<256x128xbf16>, vector<128x256xbf16>, vector<256x256xf32> -> vector<256x256xf32>
    %c0_4 = arith.constant 0 : index
    %c0_5 = arith.constant 0 : index
    %6 = vector.load %arg4[%c0_4, %c0_5] : memref<1x256xf32, #tpu.memory_space<vmem>>, vector<1x256xf32>
    %7 = vector.broadcast %6 : vector<1x256xf32> to vector<256x256xf32>
    %8 = arith.addf %5, %7 : vector<256x256xf32>
    %cst_6 = arith.constant 5.000000e-01 : f32
    %9 = vector.broadcast %cst_6 : f32 to vector<256x256xf32>
    %10 = arith.mulf %9, %8 : vector<256x256xf32>
    %cst_7 = arith.constant 0.707106769 : f32
    %11 = vector.broadcast %cst_7 : f32 to vector<256x256xf32>
    %12 = arith.mulf %8, %11 : vector<256x256xf32>
    %13 = math.erf %12 : vector<256x256xf32>
    %cst_8 = arith.constant 1.000000e+00 : f32
    %14 = vector.broadcast %cst_8 : f32 to vector<256x256xf32>
    %15 = arith.addf %14, %13 : vector<256x256xf32>
    %16 = arith.mulf %10, %15 : vector<256x256xf32>
    %c0_9 = arith.constant 0 : index
    %c0_10 = arith.constant 0 : index
    %17 = vector.load %arg8[%c0_9, %c0_10] : memref<256x128xf32, #tpu.memory_space<vmem>>, vector<256x128xf32>
    %18 = arith.truncf %16 : vector<256x256xf32> to vector<256x256xbf16>
    %c0_11 = arith.constant 0 : index
    %c0_12 = arith.constant 0 : index
    %19 = vector.load %arg5[%c0_11, %c0_12] : memref<256x128xbf16, #tpu.memory_space<vmem>>, vector<256x128xbf16>
    %cst_13 = arith.constant dense<0.000000e+00> : vector<256x128xf32>
    %20 = tpu.matmul %18, %19, %cst_13 {dimension_numbers = #tpu.dot_dimension_numbers<[1], [0], [0], [1], [0, 0, 1, 1], [], []>} : vector<256x256xbf16>, vector<256x128xbf16>, vector<256x128xf32> -> vector<256x128xf32>
    %21 = arith.addf %17, %20 : vector<256x128xf32>
    %c0_14 = arith.constant 0 : index
    %c0_15 = arith.constant 0 : index
    %22 = vector.load %arg8[%c0_14, %c0_15] : memref<256x128xf32, #tpu.memory_space<vmem>>, vector<256x128xf32>
    tpu.vector_store %arg8[%c0_14, %c0_15], %21 {strides = array<i32>} : memref<256x128xf32, #tpu.memory_space<vmem>>, vector<256x128xf32>,
    %c1_i32 = arith.constant 1 : i32
    %23 = arith.cmpi eq, %arg1, %c1_i32 : i32
    %24 = arith.extui %23 : i1 to i32
    %c0_i32_16 = arith.constant 0 : i32
    %25 = arith.cmpi ne, %24, %c0_i32_16 : i32
    scf.if %25 {
      %c0_17 = arith.constant 0 : index
      %c0_18 = arith.constant 0 : index
      %26 = vector.load %arg8[%c0_17, %c0_18] : memref<256x128xf32, #tpu.memory_space<vmem>>, vector<256x128xf32>
      %c0_19 = arith.constant 0 : index
      %c0_20 = arith.constant 0 : index
      %27 = vector.load %arg6[%c0_19, %c0_20] : memref<1x128xf32, #tpu.memory_space<vmem>>, vector<1x128xf32>
      %28 = vector.broadcast %27 : vector<1x128xf32> to vector<256x128xf32>
      %29 = arith.addf %26, %28 : vector<256x128xf32>
      %c0_21 = arith.constant 0 : index
      %c0_22 = arith.constant 0 : index
      %30 = vector.load %arg7[%c0_21, %c0_22] : memref<256x128xf32, #tpu.memory_space<vmem>>, vector<256x128xf32>
      tpu.vector_store %arg7[%c0_21, %c0_22], %29 {strides = array<i32>} : memref<256x128xf32, #tpu.memory_space<vmem>>, vector<256x128xf32>,
    } else {
    }
    return
  }
  func.func @transform_0(%arg0: i32, %arg1: i32) -> (i32, i32) {
    %c0_i32 = arith.constant 0 : i32
    %c0_i32_0 = arith.constant 0 : i32
    return %arg0, %c0_i32 : i32, i32
  }
  func.func @transform_1(%arg0: i32, %arg1: i32) -> (i32, i32) {
    %c0_i32 = arith.constant 0 : i32
    %c0_i32_0 = arith.constant 0 : i32
    return %c0_i32, %arg1 : i32, i32
  }
  func.func @transform_2(%arg0: i32, %arg1: i32) -> (i32, i32) {
    %c0_i32 = arith.constant 0 : i32
    %c0_i32_0 = arith.constant 0 : i32
    return %c0_i32, %arg1 : i32, i32
  }
  func.func @transform_3(%arg0: i32, %arg1: i32) -> (i32, i32) {
    %c0_i32 = arith.constant 0 : i32
    %c0_i32_0 = arith.constant 0 : i32
    return %arg1, %c0_i32 : i32, i32
  }
  func.func @transform_4(%arg0: i32, %arg1: i32) -> (i32, i32) {
    %c0_i32 = arith.constant 0 : i32
    %c0_i32_0 = arith.constant 0 : i32
    %c0_i32_1 = arith.constant 0 : i32
    return %c0_i32, %c0_i32_0 : i32, i32
  }
  func.func @transform_5(%arg0: i32, %arg1: i32) -> (i32, i32) {
    %c0_i32 = arith.constant 0 : i32
    %c0_i32_0 = arith.constant 0 : i32
    return %arg0, %c0_i32 : i32, i32
  }
}

</mosaic_0001>

<bundles_post_ra>
// kernel: tpu_custom_call.1
= control target key start
LH: loop header
LB: loop body
LE: loop exit
PB: predicated region body
PF: predicated region fallthrough
CT: control target
= control target key end

     0   :  { %s3538_s0 = inlined_call_operand.hbm [shape: bf16[512,128], index: 0, kind: input, shape index: {}]   ;;  %s3539_s1 = inlined_call_operand.hbm [shape: bf16[128,512], index: 1, kind: input, shape index: {}]   ;;  %s3540_s2 = inlined_call_operand.hbm [shape: f32[1,512], index: 2, kind: input, shape index: {}]   ;;  %s3541_s3 = inlined_call_operand.hbm [shape: bf16[512,128], index: 3, kind: input, shape index: {}]   ;;  %s3542_s4 = inlined_call_operand.hbm [shape: f32[1,128], index: 4, kind: input, shape index: {}]   ;;  %s3543_s5 = inlined_call_operand.hbm [shape: f32[512,128], index: 5, kind: output, shape index: {}]  }
   0x1   :  { %3563 = sst [smem:[#allocation27_spill]] %s3538_s0 }
   0x2   :  { %3564 = sst [smem:[#allocation28_spill]] %s3539_s1 }
   0x3   :  { %3565 = sst [smem:[#allocation29_spill]] %s3542_s4 }
   0x4   :  { %3566 = sst [smem:[#allocation30_spill]] %s3543_s5 }
   0x5   :  { %10 = vsyncpa [#allocation4], 0 }
   0x6   :  { %12 = vsyncpa [#allocation4 + $0x1], 0 }
   0x7   :  { %13 = vsyncpa [#allocation7], 0 }
   0x8   :  { %15 = vsyncpa [#allocation7 + $0x1], 0 }
   0x9   :  { %16 = vsyncpa [#allocation10], 0 }
   0xa   :  { %18 = vsyncpa [#allocation10 + $0x1], 0 }
   0xb   :  { %19 = vsyncpa [#allocation5], 0 }
   0xc   :  { %21 = vsyncpa [#allocation5 + $0x1], 0  ;;  %s2717_s18 = smov 0   ;;  %s2719_s19 = smov 0  }
   0xd   :  { %s2721_s20 = smov 0   ;;  %s2723_s21 = smov 0  }
   0xe   :  { %s2725_s22 = smov 0   ;;  %s2727_s23 = smov 0  }
   0xf   :  { %s2729_s24 = smov 0   ;;  %s2731_s25 = smov 0  }
  0x10   :  { %s2733_s26 = smov 0   ;;  %s2735_s27 = smov 0  }
  0x11   :  { %s2737_s28 = smov 0  }
  0x12 LB: > { %3567 = sst [smem:[#allocation18_spill]] %s2642_s21  ;;  %s2771_s29 = sadd.s32 4294967295, %s2670_s28   ;;  %s2670_s28 = sphi %s2737_s28, %s27_s28   ;;  %s2666_s27 = sphi %s2735_s27, %s3617_s27   ;;  %s2662_s26 = sphi %s2733_s26, %s3625_s26   ;;  %s2658_s25 = sphi %s2731_s25, %s3615_s25   ;;  %s2654_s24 = sphi %s2729_s24, %s3624_s24   ;;  %s2650_s23 = sphi %s2727_s23, %s3623_s23   ;;  %s2646_s22 = sphi %s2725_s22, %s3622_s22   ;;  %s2642_s21 = sphi %s2723_s21, %s3621_s21   ;;  %s2638_s20 = sphi %s2721_s20, %s3620_s20   ;;  %s2634_s19 = sphi %s2719_s19, %s3619_s19   ;;  %s2630_s18 = sphi %s2717_s18, %s3618_s18  }
  0x13   : > { %3568 = sst [smem:[#allocation19_spill]] %s2654_s24  ;;  %s1871_s30 = sadd.s32 4294967294, %s2670_s28  }
  0x14   : > { %3569 = sst [smem:[#allocation20_spill]] %s2658_s25  ;;  %p53_p0 = scmp.ne.s32.totalorder %s2650_s23, %s2646_s22 }
  0x15   : > { %3570 = sst [smem:[#allocation21_spill]] %s2666_s27  ;;  %p54_p1 = scmp.eq.s32.totalorder %s2670_s28, 0 }
  0x16   : > { %p59_p2 = scmp.ne.s32.totalorder %s2646_s22, %s2642_s21  ;;  %p3547_p3 = scmp.eq.s32.totalorder %s2771_s29, 0 }
  0x17   : > { %p2785_p4 = por %p54_p1, %p53_p0  ;;  %p79_p5 = scmp.ne.s32.totalorder %s2638_s20, %s2634_s19 }
  0x18   : > { %p2796_p6 = por %p3547_p3, %p59_p2  ;;  %p85_p7 = scmp.ne.s32.totalorder %s2634_s19, %s2630_s18 }
  0x19   : > { %s3571_s8 = scalar_select %p2785_p4, 1, 0 }
  0x1a   : > { %s3572_s9 = scalar_select %p2796_p6, 1, 0 }
  0x1b   : > { %p2801_p8 = por %p79_p5, %p54_p1  ;;  %p182_p9 = scmp.eq.s32.totalorder %s2771_s29, 3 }
  0x1c   : > { %p2808_p10 = por %p85_p7, %p3547_p3  ;;  %p188_p11 = scmp.eq.s32.totalorder %s1871_s30, 3 }
  0x1d   : > { %p2815_p12 = por %p182_p9, %p53_p0  ;;  %p1872_p13 = scmp.ge.s32.totalorder %s2670_s28, 1 }
  0x1e   : > { %s3574_s11 = scalar_select %p2808_p10, 1, 0 }
  0x1f   : > { %s3576_s12 = scalar_select %p2815_p12, 1, 0 }
  0x20   : > { %3575 = sst [smem:[#allocation22_spill]] %s3574_s11  ;;  %p2823_p1 = por %p188_p11, %p59_p2 }
  0x21   : > { %3577 = sst [smem:[#allocation23_spill]] %s3576_s12  ;;  %p195_p5 = scmp.lt.s32.totalorder %s2670_s28, 5 }
  0x22   : > { %s3578_s13 = scalar_select %p2823_p1, 1, 0 }
  0x23   : > { %p2828_p6 = pnand %p1872_p13, %p195_p5  ;;  %s2672_s15 = smov [#allocation11]  }
  0x24   : > { %3579 = sst [smem:[#allocation24_spill]] %s3578_s13  ;;  %s208_s16 = sshll.u32 %s2672_s15, 4  ;;  %s209_s16 = int_to_ptr.vmem [resolvable:$true] %s208_s16 }
  0x25   : > { %s3580_s14 = scalar_select %p2828_p6, 1, 0 }
  0x26   : > { %p2081_p0 = pneg %p2828_p6  ;;  %p3549_p7 = scmp.lt.s32.totalorder %s2670_s28, 4 }
  0x27   : > { %s3583_s4 = sld [smem:[#allocation29_spill]] }
  0x28   : > { %p2838_p9 = pnand %p2081_p0, %p3547_p3  ;;  %p2846_p2 = pnand %p3549_p7, %p2801_p8 }
  0x2a   : > { %s3582_s30 = scalar_select %p2846_p2, 1, 0 }
  0x2b   : > { %p2390_p13 = pneg %p2838_p9 }
  0x2d   : > { %s2388_s15 = scalar_lea.hbm %s3583_s4, 16 }
  0x2e   : > { %p2389_p11 = scmp.ne.s32.totalorder %s3583_s4, %s2388_s15  ;;  %p2395_p3 = scmp.lt.u32.totalorder %s2388_s15, %s3583_s4 }
  0x30   : > { %p2391_p5 = pnand %p2390_p13, %p2389_p11 }
  0x32   : > { %p2392_p0 = pneg %p2391_p5 }
  0x34   : > { %p2397_p8 = pnand %p2395_p3, %p2392_p0 }
  0x36   : > { %2400 = shalt.err (!%p2397_p8)
}
  0x37   : > { %s2401_s5 = scalar_lea.vmem %s209_s16, 16  ;;  %s2408_s6 = scalar_lea.vmem %s209_s16, 32 }
  0x38   : > { %p2402_p7 = scmp.ne.s32.totalorder %s209_s16, %s2401_s5  ;;  %p2409_p10 = scmp.lt.s32.totalorder %s209_s16, %s209_s16 }
  0x39   : > { %p2410_p6 = scmp.lt.s32.totalorder %s2408_s6, %s2401_s5 }
  0x3a   : > { %p2404_p1 = pnand %p2402_p7, %p2390_p13 }
  0x3b   : > { %p2411_p4 = por %p2410_p6, %p2409_p10 }
  0x3c   : > { %p2405_p12 = pneg %p2404_p1 }
  0x3e   : > { %p2412_p2 = pnand %p2411_p4, %p2405_p12 }
  0x40   : > { %2415 = shalt.err (!%p2412_p2)
}
  0x41   : > { %2084 = dma.hbm_to_vmem [thread:$0]  (!%p2838_p9), %s3583_s4, 16, %s209_s16, [#allocation10]  }
  0x42   : > { %s3554_s13 = sand.u32 1, %s2638_s20   ;;  %s1951_s17 = sshll.u32 %s2662_s26, 7 }
  0x43   : > { %s2870_s15 = sshll.u32 %s3554_s13, 7  ;;  %s3584_s1 = sld [smem:[#allocation28_spill]] }
  0x44   : > { %s244_s18 = scalar_lea.vmem [#allocation6], %s2870_s15  ;;  %s3585_s16 = sand.u32 1, %s2670_s28  }
  0x45   : > { %s251_s21 = sshll.u32 %s244_s18, 4  ;;  %s2882_s7 = scalar_lea.sflag [#allocation7], %s3585_s16  ;;  %s2878_s21 = int_to_ptr.vmem [resolvable:$true] %s251_s21 }
  0x46   : > { %p3586_p4 = scmp.ne.s32.totalorder %s3582_s30, 0 }
  0x48   : > { %p2888_p6 = pneg %p3586_p4 }
  0x49   : > { %s2875_s6 = scalar_lea.hbm %s3584_s1, %s1951_s17  ;;  %s2421_s10 = scalar_lea.hbm %s3584_s1, 4096 }
  0x4a   : > { %s2416_s4 = scalar_lea.hbm %s2875_s6, 2048  ;;  %p2422_p1 = scmp.lt.u32.totalorder %s2875_s6, %s3584_s1 }
  0x4b   : > { %p2417_p3 = scmp.ne.s32.totalorder %s2875_s6, %s2416_s4  ;;  %p2423_p7 = scmp.lt.u32.totalorder %s2421_s10, %s2416_s4 }
  0x4c   : > { %p2425_p2 = scmp.lt.u32.totalorder %s2416_s4, %s2875_s6 }
  0x4d   : > { %p2419_p10 = pnand %p2888_p6, %p2417_p3  ;;  %p2424_p9 = por %p2423_p7, %p2422_p1 }
  0x4f   : > { %p2420_p12 = pneg %p2419_p10  ;;  %p2426_p11 = por %p2425_p2, %p2424_p9 }
  0x51   : > { %p2427_p13 = pnand %p2426_p11, %p2420_p12 }
  0x53   : > { %2430 = shalt.err (!%p2427_p13)
}
  0x54   : > { %s2431_s16 = scalar_lea.vmem %s2878_s21, 2048  ;;  %s2673_s17 = smov [#allocation6]  }
  0x55   : > { %p2432_p5 = scmp.ne.s32.totalorder %s2878_s21, %s2431_s16  ;;  %s2436_s5 = sshll.u32 %s2673_s17, 4  ;;  %s2437_s5 = int_to_ptr.vmem [resolvable:$false] %s2436_s5 }
  0x56   : > { %s2438_s12 = scalar_lea.vmem %s2437_s5, 4096  ;;  %p2439_p3 = scmp.lt.s32.totalorder %s2878_s21, %s2437_s5 }
  0x57   : > { %p2434_p0 = pnand %p2432_p5, %p2888_p6  ;;  %p2440_p10 = scmp.lt.s32.totalorder %s2438_s12, %s2431_s16 }
  0x59   : > { %p2435_p8 = pneg %p2434_p0  ;;  %p2441_p1 = por %p2440_p10, %p2439_p3 }
  0x5b   : > { %p2442_p7 = pnand %p2441_p1, %p2435_p8 }
  0x5d   : > { %2445 = shalt.err (!%p2442_p7)
}
  0x5e   : > { %s2674_s4 = smov 256   ;;  %s2675_s10 = smov 128  }
  0x5f   : > { %s2676_s18 = smov 8   ;;  %s36_s16 = sadd.s32 1, %s2662_s26 }
  0x60   : > { %2091 = dma.hbm_to_vmem [thread:$0]  (!%p3586_p4), %s2875_s6, 2048, %s2878_s21, %s2882_s7, %s2674_s4, %s2675_s10, %s2676_s18  }
  0x61   : > { %p37_p12 = scmp.ge.s32.totalorder %s36_s16, 2  ;;  %s39_s17 = sadd.s32 1, %s2666_s27 }
  0x62   : > { %s219_s5 = sand.u32 1, %s2650_s23   ;;  %s1950_s25 = sshll.u32 %s2666_s27, 11 }
  0x63   : > { %s3627_s16 = smov (%p37_p12, %s36_s16), 0  ;;  %s3629_s17 = smov (!%p37_p12, %s39_s17), %s2666_s27 }
  0x64   : > { %3588 = sst [smem:[#allocation25_spill]] %s3627_s16  ;;  %s69_s12 = ssub.s32 %s2662_s26, %s3627_s16 }
  0x65   : > { %p41_p9 = scmp.ge.s32.totalorder %s3629_s17, 2  ;;  %p70_p2 = scmp.eq.s32.totalorder %s69_s12, 0 }
  0x66   : > { %s1875_s1 = sshll.u32 %s219_s5, 7  ;;  %s3590_s6 = sadd.s32 1, %s2638_s20 }
  0x67   : > { %s3631_s17 = smov (%p41_p9, %s3629_s17), 0  ;;  %s3591_s0 = sld [smem:[#allocation27_spill]] }
  0x68   : > { %3589 = sst [smem:[#allocation26_spill]] %s3631_s17  ;;  %s43_s4 = ssub.s32 %s2666_s27, %s3631_s17 }
  0x69   : > { %s2926_s21 = scalar_select %p70_p2, %s2638_s20, %s3590_s6  }
  0x6a   : > { %p44_p11 = scmp.eq.s32.totalorder %s43_s4, 0  ;;  %s223_s12 = scalar_lea.vmem [#allocation3], %s1875_s1 }
  0x6b   : > { %s230_s16 = sshll.u32 %s223_s12, 4  ;;  %p3592_p13 = scmp.ne.s32.totalorder %s3571_s8, 0  ;;  %s2948_s16 = int_to_ptr.vmem [resolvable:$true] %s230_s16 }
  0x6c   : > { %p3593_p5 = scmp.lt.s32.totalorder %s2670_s28, 4  ;;  %s3595_s6 = sadd.s32 1, %s2650_s23 }
  0x6d   : > { %s2933_s24 = scalar_lea.hbm %s3591_s0, %s1950_s25  ;;  %s2950_s25 = scalar_lea.sflag [#allocation4], %s219_s5 }
  0x6e   : > { %p2939_p0 = pnand %p3593_p5, %p3592_p13  ;;  %s2446_s10 = scalar_lea.hbm %s2933_s24, 2048 }
  0x6f   : > { %s2946_s4 = scalar_select %p44_p11, %s2650_s23, %s3595_s6  }
  0x70   : > { %p2447_p8 = scmp.ne.s32.totalorder %s2933_s24, %s2446_s10  ;;  %p2448_p3 = pneg %p2939_p0 }
  0x71   : > { %s2451_s18 = scalar_lea.hbm %s3591_s0, 4096  ;;  %p2452_p7 = scmp.lt.u32.totalorder %s2933_s24, %s3591_s0 }
  0x72   : > { %p2449_p10 = pnand %p2448_p3, %p2447_p8  ;;  %p2453_p12 = scmp.lt.u32.totalorder %s2451_s18, %s2446_s10 }
  0x73   : > { %p2455_p2 = scmp.lt.u32.totalorder %s2446_s10, %s2933_s24 }
  0x74   : > { %p2450_p1 = pneg %p2449_p10  ;;  %p2454_p9 = por %p2453_p12, %p2452_p7 }
  0x76   : > { %p2456_p11 = por %p2455_p2, %p2454_p9 }
  0x78   : > { %p2457_p13 = pnand %p2456_p11, %p2450_p1 }
  0x7a   : > { %2460 = shalt.err (!%p2457_p13)
}
  0x7b   : > { %s2461_s5 = scalar_lea.vmem %s2948_s16, 2048  ;;  %s2677_s6 = smov [#allocation3]  }
  0x7c   : > { %p2462_p5 = scmp.ne.s32.totalorder %s2948_s16, %s2461_s5  ;;  %s2466_s1 = sshll.u32 %s2677_s6, 4  ;;  %s2467_s1 = int_to_ptr.vmem [resolvable:$false] %s2466_s1 }
  0x7d   : > { %s2468_s17 = scalar_lea.vmem %s2467_s1, 4096  ;;  %p2469_p4 = scmp.lt.s32.totalorder %s2948_s16, %s2467_s1 }
  0x7e   : > { %p2464_p8 = pnand %p2462_p5, %p2448_p3  ;;  %p2470_p7 = scmp.lt.s32.totalorder %s2468_s17, %s2461_s5 }
  0x80   : > { %p2465_p10 = pneg %p2464_p8  ;;  %p2471_p12 = por %p2470_p7, %p2469_p4 }
  0x82   : > { %p2472_p9 = pnand %p2471_p12, %p2465_p10 }
  0x84   : > { %2475 = shalt.err (!%p2472_p9)
}
  0x85   : > { %s2678_s10 = smov 64   ;;  %s2679_s8 = smov 4  }
  0x86   : > { %2088 = dma.hbm_to_vmem [thread:$0]  (!%p2939_p0), %s2933_s24, 2048, %s2948_s16, %s2950_s25, %s2678_s10, %s2678_s10, %s2679_s8  }
  0x87   : > { %s3596_s18 = sand.u32 1, %s2638_s20   ;;  %s1952_s5 = sshll.u32 %s2662_s26, 5 }
  0x88   : > { %s1881_s12 = sshll.u32 %s3596_s18, 1  ;;  %s2987_s17 = scalar_lea.hbm %s3540_s2, %s1952_s5 }
  0x89   : > { %s265_s0 = scalar_lea.vmem [#allocation8], %s1881_s12  ;;  %s2476_s11 = scalar_lea.hbm %s2987_s17, 32 }
  0x8a   : > { %s273_s27 = sshll.u32 %s265_s0, 4  ;;  %p2477_p4 = scmp.ne.s32.totalorder %s2987_s17, %s2476_s11  ;;  %s274_s27 = int_to_ptr.vmem [resolvable:$true] %s273_s27 }
  0x8b   : > { %s2481_s25 = scalar_lea.hbm %s3540_s2, 64  ;;  %p2482_p1 = scmp.lt.u32.totalorder %s2987_s17, %s3540_s2 }
  0x8c   : > { %p2479_p3 = pnand %p2477_p4, %p2888_p6  ;;  %p2483_p2 = scmp.lt.u32.totalorder %s2481_s25, %s2476_s11 }
  0x8d   : > { %p2485_p13 = scmp.lt.u32.totalorder %s2476_s11, %s2987_s17 }
  0x8e   : > { %p2480_p0 = pneg %p2479_p3  ;;  %p2484_p11 = por %p2483_p2, %p2482_p1 }
  0x90   : > { %p2486_p5 = por %p2485_p13, %p2484_p11 }
  0x92   : > { %p2487_p8 = pnand %p2486_p5, %p2480_p0 }
  0x94   : > { %2490 = shalt.err (!%p2487_p8)
}
  0x95   : > { %s2491_s0 = scalar_lea.vmem %s274_s27, 32  ;;  %s2680_s12 = smov [#allocation8]  }
  0x96   : > { %p2492_p10 = scmp.ne.s32.totalorder %s274_s27, %s2491_s0  ;;  %s2496_s5 = sshll.u32 %s2680_s12, 4  ;;  %s2497_s5 = int_to_ptr.vmem [resolvable:$false] %s2496_s5 }
  0x97   : > { %s2498_s1 = scalar_lea.vmem %s2497_s5, 64  ;;  %p2499_p9 = scmp.lt.s32.totalorder %s274_s27, %s2497_s5 }
  0x98   : > { %p2494_p7 = pnand %p2492_p10, %p2888_p6  ;;  %p2500_p4 = scmp.lt.s32.totalorder %s2498_s1, %s2491_s0 }
  0x9a   : > { %p2495_p12 = pneg %p2494_p7  ;;  %p2501_p3 = por %p2500_p4, %p2499_p9 }
  0x9c   : > { %p2502_p1 = pnand %p2501_p3, %p2495_p12 }
  0x9e   : > { %2505 = shalt.err (!%p2502_p1)
}
  0x9f   : > { %p3597_p2 = scmp.ne.s32.totalorder %s3582_s30, 0  ;;  %s1953_s11 = sshll.u32 %s2662_s26, 11 }
  0xa0   : > { %s284_s24 = scalar_lea.vmem [#allocation9], %s2870_s15  ;;  %s3012_s6 = scalar_lea.hbm %s3541_s3, %s1953_s11 }
  0xa1   : > { %2094 = dma.hbm_to_vmem [thread:$0]  (!%p3597_p2), %s2987_s17, 32, %s274_s27, %s2882_s7  }
  0xa2   : > { %s291_s16 = sshll.u32 %s284_s24, 4  ;;  %s3598_s0 = sand.u32 1, %s2670_s28   ;;  %s3014_s16 = int_to_ptr.vmem [resolvable:$true] %s291_s16 }
  0xa3   : > { %s3018_s12 = scalar_lea.sflag [#allocation10], %s3598_s0  ;;  %s2506_s5 = scalar_lea.hbm %s3012_s6, 2048 }
  0xa4   : > { %p2507_p0 = scmp.ne.s32.totalorder %s3012_s6, %s2506_s5  ;;  %s2511_s7 = scalar_lea.hbm %s3541_s3, 4096 }
  0xa5   : > { %p2512_p5 = scmp.lt.u32.totalorder %s3012_s6, %s3541_s3  ;;  %p2513_p8 = scmp.lt.u32.totalorder %s2511_s7, %s2506_s5 }
  0xa6   : > { %p2509_p11 = pnand %p2507_p0, %p2888_p6  ;;  %p2515_p7 = scmp.lt.u32.totalorder %s2506_s5, %s3012_s6 }
  0xa7   : > { %p2514_p10 = por %p2513_p8, %p2512_p5 }
  0xa8   : > { %p2510_p13 = pneg %p2509_p11 }
  0xa9   : > { %p2516_p12 = por %p2515_p7, %p2514_p10 }
  0xab   : > { %p2517_p9 = pnand %p2516_p12, %p2510_p13 }
  0xad   : > { %2520 = shalt.err (!%p2517_p9)
}
  0xae   : > { %s2521_s11 = scalar_lea.vmem %s3014_s16, 2048  ;;  %s2681_s24 = smov [#allocation9]  }
  0xaf   : > { %p2522_p4 = scmp.ne.s32.totalorder %s3014_s16, %s2521_s11  ;;  %s2526_s25 = sshll.u32 %s2681_s24, 4  ;;  %s2527_s25 = int_to_ptr.vmem [resolvable:$false] %s2526_s25 }
  0xb0   : > { %s2528_s18 = scalar_lea.vmem %s2527_s25, 4096  ;;  %p2529_p0 = scmp.lt.s32.totalorder %s3014_s16, %s2527_s25 }
  0xb1   : > { %p2524_p3 = pnand %p2522_p4, %p2888_p6  ;;  %p2530_p11 = scmp.lt.s32.totalorder %s2528_s18, %s2521_s11 }
  0xb3   : > { %p2525_p1 = pneg %p2524_p3  ;;  %p2531_p5 = por %p2530_p11, %p2529_p0 }
  0xb5   : > { %p2532_p8 = pnand %p2531_p5, %p2525_p1 }
  0xb7   : > { %2535 = shalt.err (!%p2532_p8)
}
  0xb8   : > { %2097 = dma.hbm_to_vmem [thread:$0]  (!%p3597_p2), %s3012_s6, 2048, %s3014_s16, %s3018_s12, %s2678_s10, %s2678_s10, %s2679_s8  }
  0xb9   : > { %p3599_p6 = scmp.ne.s32.totalorder %s3580_s14, 0 }
  0xba   : > { %s3048_s13 = sand.u32 (!%p3599_p6), 1, %s2646_s22   ;;  %p3600_p13 = scmp.ne.s32.totalorder (!%p3599_p6), %s3572_s9, 0 }
  0xbb   : > { %303 = sbr.rel (%p3599_p6) target bundleno = 882 (0x372), region = 40  ;;  %s1888_s0 = sshll.u32 (!%p3599_p6), %s3048_s13, 7 }
  0xbc   : > { %s306_s5 = scalar_lea.sflag (!%p3599_p6), [#allocation4], %s3048_s13  ;;  %s3052_s27 = scalar_lea.vmem (!%p3599_p6), [#allocation3], %s1888_s0 }
  0xc2   : > { %2609 = dma.done.wait (%p3600_p13), %s306_s5, 2048  }
  0xc3   : > { %2611 = vsyncadd (%p3600_p13), %s306_s5, 4294965248  ;;  %s3601_s30 = sld [smem:[#allocation22_spill]]  ;;  %s314_s14 = sand.u32 1, %s2771_s29  }
  0xc4   : > { %s316_s10 = sand.u32 1, %s2634_s19   ;;  %s315_s16 = scalar_lea.sflag [#allocation7], %s314_s14 }
  0xc5   : > { %s1889_s8 = sshll.u32 %s316_s10, 7 }
  0xc6   : > { %s3060_s6 = scalar_lea.vmem [#allocation6], %s1889_s8 }
  0xc9   : > { %p3602_p2 = scmp.ne.s32.totalorder %s3601_s30, 0 }
  0xcb   : > { %2613 = dma.done.wait (%p3602_p2), %s315_s16, 2080  }
  0xcc   : > { %2615 = vsyncadd (%p3602_p2), %s315_s16, 4294965216  ;;  %s3066_s12 = sshll.u32 %s316_s10, 1  ;;  %s333_s15 = scalar_lea.sflag [#allocation10], %s314_s14 }
  0xcd   : > { %s327_s9 = scalar_lea.vmem [#allocation8], %s3066_s12  ;;  %s3069_s7 = scalar_lea.vmem [#allocation9], %s1889_s8 }
  0xce   : > { %2617 = dma.done.wait (%p3602_p2), %s333_s15, 2048  }
  0xcf   : > { %2619 = vsyncadd (%p3602_p2), %s333_s15, 4294965248  ;;  %p3603_p10 = scmp.eq.s32.totalorder %s2771_s29, 0 }
  0xd1   : > { %2621 = dma.done.wait (%p3603_p10), [#allocation10], 16   ;;  %p3604_p7 = pmov %p3603_p10 }
  0xd2   : > { %s1893_s17 = sshll.u32 %s3048_s13, 8  ;;  %s3605_s11 = sld [smem:[#allocation19_spill]] }
  0xd3   : > { %2623 = vsyncadd (%p3604_p7), [#allocation10], 4294967280  ;;  %s3080_s1 = scalar_lea.vmem [#allocation12], %s1893_s17 }
  0xd8   : > { %p1894_p12 = scmp.ne.s32.totalorder %s3605_s11, 0 }
  0xd9   : > { %v2682_v0 = vmov (!%p1894_p12), 0.0  }
  0xda   : > { %391 = sbr.rel (%p1894_p12) target bundleno = 234 (0xea), region = 64  ;;  %392 = vst [vmem:[#allocation2] sm:$0xff] (!%p1894_p12), %v2682_v0  ;;  %393 = vst [vmem:[#allocation2 + $0x8] sm:$0xff] (!%p1894_p12), %v2682_v0 }
  0xdb   : > { %394 = vst [vmem:[#allocation2 + $0x10] sm:$0xff] (!%p1894_p12), %v2682_v0  ;;  %395 = vst [vmem:[#allocation2 + $0x18] sm:$0xff] (!%p1894_p12), %v2682_v0 }
  0xdc   : > { %396 = vst [vmem:[#allocation2 + $0x20] sm:$0xff] (!%p1894_p12), %v2682_v0  ;;  %397 = vst [vmem:[#allocation2 + $0x28] sm:$0xff] (!%p1894_p12), %v2682_v0 }
  0xdd   : > { %398 = vst [vmem:[#allocation2 + $0x30] sm:$0xff] (!%p1894_p12), %v2682_v0  ;;  %399 = vst [vmem:[#allocation2 + $0x38] sm:$0xff] (!%p1894_p12), %v2682_v0 }
  0xde   : > { %400 = vst [vmem:[#allocation2 + $0x40] sm:$0xff] (!%p1894_p12), %v2682_v0  ;;  %401 = vst [vmem:[#allocation2 + $0x48] sm:$0xff] (!%p1894_p12), %v2682_v0 }
  0xdf   : > { %402 = vst [vmem:[#allocation2 + $0x50] sm:$0xff] (!%p1894_p12), %v2682_v0  ;;  %403 = vst [vmem:[#allocation2 + $0x58] sm:$0xff] (!%p1894_p12), %v2682_v0 }
  0xe0   : > { %404 = vst [vmem:[#allocation2 + $0x60] sm:$0xff] (!%p1894_p12), %v2682_v0  ;;  %405 = vst [vmem:[#allocation2 + $0x68] sm:$0xff] (!%p1894_p12), %v2682_v0 }
  0xe1   : > { %406 = vst [vmem:[#allocation2 + $0x70] sm:$0xff] %v2682_v0  ;;  %407 = vst [vmem:[#allocation2 + $0x78] sm:$0xff] %v2682_v0 }
  0xe2   : > { %408 = vst [vmem:[#allocation2 + $0x80] sm:$0xff] %v2682_v0  ;;  %409 = vst [vmem:[#allocation2 + $0x88] sm:$0xff] %v2682_v0 }
  0xe3   : > { %410 = vst [vmem:[#allocation2 + $0x90] sm:$0xff] %v2682_v0  ;;  %411 = vst [vmem:[#allocation2 + $0x98] sm:$0xff] %v2682_v0 }
  0xe4   : > { %412 = vst [vmem:[#allocation2 + $0xa0] sm:$0xff] %v2682_v0  ;;  %413 = vst [vmem:[#allocation2 + $0xa8] sm:$0xff] %v2682_v0 }
  0xe5   : > { %414 = vst [vmem:[#allocation2 + $0xb0] sm:$0xff] %v2682_v0  ;;  %415 = vst [vmem:[#allocation2 + $0xb8] sm:$0xff] %v2682_v0 }
  0xe6   : > { %416 = vst [vmem:[#allocation2 + $0xc0] sm:$0xff] %v2682_v0  ;;  %417 = vst [vmem:[#allocation2 + $0xc8] sm:$0xff] %v2682_v0 }
  0xe7   : > { %418 = vst [vmem:[#allocation2 + $0xd0] sm:$0xff] %v2682_v0  ;;  %419 = vst [vmem:[#allocation2 + $0xd8] sm:$0xff] %v2682_v0 }
  0xe8   : > { %420 = vst [vmem:[#allocation2 + $0xe0] sm:$0xff] %v2682_v0  ;;  %421 = vst [vmem:[#allocation2 + $0xe8] sm:$0xff] %v2682_v0 }
  0xe9   : > { %422 = vst [vmem:[#allocation2 + $0xf0] sm:$0xff] %v2682_v0  ;;  %423 = vst [vmem:[#allocation2 + $0xf8] sm:$0xff] %v2682_v0 }
  0xea PF: > { %v2204_v1 = vld [vmem:[%s3060_s6 + $0x4] ss:$8 sps:$4 sm:$0xff]   ;;  %v2206_v2 = vld [vmem:[%s3060_s6] ss:$8 sps:$4 sm:$0xff]   ;;  %v2683_v3 = vmov 0   ;;  %v2230_v24 = vld [vmem:[%s3052_s27 + $0x10] sm:$0xff]   ;;  %v474_v50 = vlaneseq }
  0xeb   : > { %692 = vmatprep.mubr.bf16.mxu0 %v2683_v3  ;;  %660 = vmatprep.subr.bf16.mxu0 %v2204_v1  ;;  %v2207_v4 = vld [vmem:[%s3060_s6 + $0x14] ss:$8 sps:$4 sm:$0xff]   ;;  %v2209_v5 = vld [vmem:[%s3060_s6 + $0x10] ss:$8 sps:$4 sm:$0xff]   ;;  %v2210_v6 = vld [vmem:[%s3060_s6 + $0x24] ss:$8 sps:$4 sm:$0xff]  }
  0xec   : > { %661 = vmatpush1.bf16.msra.mxu0 %v2206_v2  ;;  %v2212_v7 = vld [vmem:[%s3060_s6 + $0x20] ss:$8 sps:$4 sm:$0xff]   ;;  %v2213_v8 = vld [vmem:[%s3060_s6 + $0x34] ss:$8 sps:$4 sm:$0xff]   ;;  %v2215_v9 = vld [vmem:[%s3060_s6 + $0x30] ss:$8 sps:$4 sm:$0xff]  }
  0xed   : > { %662 = vmatprep.subr.bf16.mxu0 %v2207_v4  ;;  %v2216_v10 = vld [vmem:[%s3060_s6 + $0x44] ss:$8 sps:$4 sm:$0xff]   ;;  %v2218_v11 = vld [vmem:[%s3060_s6 + $0x40] ss:$8 sps:$4 sm:$0xff]   ;;  %v2219_v12 = vld [vmem:[%s3060_s6 + $0x54] ss:$8 sps:$4 sm:$0xff]  }
  0xee   : > { %v2221_v13 = vld [vmem:[%s3060_s6 + $0x50] ss:$8 sps:$4 sm:$0xff]   ;;  %v2222_v14 = vld [vmem:[%s3060_s6 + $0x64] ss:$8 sps:$4 sm:$0xff]   ;;  %v2224_v15 = vld [vmem:[%s3060_s6 + $0x60] ss:$8 sps:$4 sm:$0xff]  }
  0xef   : > { %v2225_v16 = vld [vmem:[%s3060_s6 + $0x74] ss:$8 sps:$4 sm:$0xff]   ;;  %v2227_v17 = vld [vmem:[%s3060_s6 + $0x70] ss:$8 sps:$4 sm:$0xff]   ;;  %v2244_v18 = vld [vmem:[%s3069_s7 + $0x40] sm:$0xff]   ;;  %v475_v51 = vshrl.u32 %v474_v50, 7 }
  0xf0   : > { %663 = vmatpush1.bf16.msra.mxu0 %v2209_v5  ;;  %v2245_v19 = vld [vmem:[%s3069_s7] sm:$0xff]   ;;  %1955 = vmatprep.subr.bf16.mxu1 %v2244_v18  ;;  %v2246_v20 = vld [vmem:[%s3069_s7 + $0x48] sm:$0xff]   ;;  %v2231_v25 = vld [vmem:[%s3052_s27 + $0x18] sm:$0xff]   ;;  %s3606_s29 = sld [smem:[#allocation19_spill]] }
  0xf1   : > { %664 = vmatprep.subr.bf16.mxu0 %v2210_v6  ;;  %v2228_v21 = vld [vmem:[%s3052_s27] sm:$0xff]   ;;  %1956 = vmatpush3.bf16.msra.mxu1 %v2245_v19  ;;  %v2247_v22 = vld [vmem:[%s3069_s7 + $0x8] sm:$0xff]   ;;  %v2235_v29 = vld [vmem:[%s3052_s27 + $0x38] sm:$0xff]   ;;  %v476_v52 = vsub.s32 0, %v475_v51  ;;  %v480_v54 = vsub.s32 1, %v475_v51 }
  0xf2   : > { %1957 = vmatprep.subr.bf16.mxu1 %v2246_v20  ;;  %v2229_v23 = vld [vmem:[%s3052_s27 + $0x8] sm:$0xff]   ;;  %v2232_v26 = vld [vmem:[%s3052_s27 + $0x20] sm:$0xff]   ;;  %v2234_v28 = vld [vmem:[%s3052_s27 + $0x30] sm:$0xff]  }
  0xf3   : > { %v2233_v27 = vld [vmem:[%s3052_s27 + $0x28] sm:$0xff]   ;;  %v2236_v30 = vld [vmem:[%s3052_s27 + $0x40] sm:$0xff]   ;;  %v2238_v32 = vld [vmem:[%s3052_s27 + $0x50] sm:$0xff]  }
  0xf4   : > { %665 = vmatpush1.bf16.msra.mxu0 %v2212_v7  ;;  %v2237_v31 = vld [vmem:[%s3052_s27 + $0x48] sm:$0xff]   ;;  %v2248_v33 = vld [vmem:[%s3069_s7 + $0x50] sm:$0xff]   ;;  %v2250_v36 = vld [vmem:[%s3069_s7 + $0x58] sm:$0xff]  }
  0xf5   : > { %666 = vmatprep.subr.bf16.mxu0 %v2213_v8  ;;  %1958 = vmatpush3.bf16.msra.mxu1 %v2247_v22  ;;  %v2239_v34 = vld [vmem:[%s3052_s27 + $0x58] sm:$0xff]   ;;  %v2252_v38 = vld [vmem:[%s3069_s7 + $0x60] sm:$0xff]   ;;  %v2254_v41 = vld [vmem:[%s3069_s7 + $0x68] sm:$0xff]  }
  0xf6   : > { %v2249_v35 = vld [vmem:[%s3069_s7 + $0x10] sm:$0xff]   ;;  %1959 = vmatprep.subr.bf16.mxu1 %v2248_v33  ;;  %v2251_v37 = vld [vmem:[%s3069_s7 + $0x18] sm:$0xff]   ;;  %v2253_v40 = vld [vmem:[%s3069_s7 + $0x20] sm:$0xff]   ;;  %p1943_p9 = scmp.ne.s32.totalorder %s3606_s29, 1 }
  0xf7   : > { %v2240_v39 = vld [vmem:[%s3052_s27 + $0x60] sm:$0xff]   ;;  %v2255_v42 = vld [vmem:[%s3069_s7 + $0x28] sm:$0xff]   ;;  %v2256_v43 = vld [vmem:[%s3069_s7 + $0x70] sm:$0xff]  }
  0xf8   : > { %667 = vmatpush1.bf16.msra.mxu0 %v2215_v9  ;;  %v2241_v44 = vld [vmem:[%s3052_s27 + $0x68] sm:$0xff]   ;;  %v2257_v45 = vld [vmem:[%s3069_s7 + $0x30] sm:$0xff]   ;;  %v2258_v46 = vld [vmem:[%s3069_s7 + $0x78] sm:$0xff]  }
  0xf9   : > { %668 = vmatprep.subr.bf16.mxu0 %v2216_v10  ;;  %1960 = vmatpush3.bf16.msra.mxu1 %v2249_v35  ;;  %v2259_v47 = vld [vmem:[%s3069_s7 + $0x38] sm:$0xff]   ;;  %v2242_v48 = vld [vmem:[%s3052_s27 + $0x70] sm:$0xff]  }
  0xfa   : > { %1961 = vmatprep.subr.bf16.mxu1 %v2250_v36  ;;  %v2243_v49 = vld [vmem:[%s3052_s27 + $0x78] sm:$0xff]   ;;  %v472_v53 = vld [vmem:[%s327_s9] sm:$0x3] }
  0xfb   : > { %v3149_v55 = vrot.slane %v472_v53, %v476_v52  ;;  %v3151_v56 = vrot.slane %v472_v53, %v480_v54 }
  0xfc   : > { %669 = vmatpush1.bf16.msra.mxu0 %v2218_v11 }
  0xfd   : > { %670 = vmatprep.subr.bf16.mxu0 %v2219_v12  ;;  %1962 = vmatpush3.bf16.msra.mxu1 %v2251_v37 }
  0xfe   : > { %1963 = vmatprep.subr.bf16.mxu1 %v2252_v38 }
 0x100   : > { %671 = vmatpush1.bf16.msra.mxu0 %v2221_v13 }
 0x101   : > { %672 = vmatprep.subr.bf16.mxu0 %v2222_v14  ;;  %1964 = vmatpush3.bf16.msra.mxu1 %v2253_v40 }
 0x102   : > { %1965 = vmatprep.subr.bf16.mxu1 %v2254_v41 }
 0x104   : > { %673 = vmatpush1.bf16.msra.mxu0 %v2224_v15 }
 0x105   : > { %674 = vmatprep.subr.bf16.mxu0 %v2225_v16  ;;  %1966 = vmatpush3.bf16.msra.mxu1 %v2255_v42 }
 0x106   : > { %1967 = vmatprep.subr.bf16.mxu1 %v2256_v43 }
 0x108   : > { %675 = vmatpush1.bf16.msra.mxu0 %v2227_v17 }
 0x109   : > { %1968 = vmatpush3.bf16.msra.mxu1 %v2257_v45 }
 0x10a   : > { %1969 = vmatprep.subr.bf16.mxu1 %v2258_v46 }
 0x10b   : > { %693 = vmatmul.mubr.bf16.vlgmr.msra.gmra.mrb[0].mxu0 %v2228_v21 }
 0x10c   : > { %702 = vmatprep.mubr.bf16.mxu0 %v2683_v3 }
 0x10d   : > { %1970 = vmatpush3.bf16.msra.mxu1 %v2259_v47 }
 0x113   : > { %703 = vmatmul.mubr.bf16.gmra.mrb[4].mxu0 %v2229_v23 }
 0x114   : > { %712 = vmatprep.mubr.bf16.mxu0 %v2683_v3 }
 0x11b   : > { %713 = vmatmul.mubr.bf16.gmra.mrb[8].mxu0 %v2230_v24 }
 0x11c   : > { %722 = vmatprep.mubr.bf16.mxu0 %v2683_v3 }
 0x123   : > { %723 = vmatmul.mubr.bf16.gmra.mrb[12].mxu0 %v2231_v25 }
 0x124   : > { %732 = vmatprep.mubr.bf16.mxu0 %v2683_v3 }
 0x12b   : > { %733 = vmatmul.mubr.bf16.gmra.mrb[16].mxu0 %v2232_v26 }
 0x12c   : > { %742 = vmatprep.mubr.bf16.mxu0 %v2683_v3 }
 0x133   : > { %743 = vmatmul.mubr.bf16.gmra.mrb[20].mxu0 %v2233_v27 }
 0x134   : > { %752 = vmatprep.mubr.bf16.mxu0 %v2683_v3 }
 0x13b   : > { %753 = vmatmul.mubr.bf16.gmra.mrb[24].mxu0 %v2234_v28 }
 0x13c   : > { %762 = vmatprep.mubr.bf16.mxu0 %v2683_v3 }
 0x143   : > { %763 = vmatmul.mubr.bf16.gmra.mrb[28].mxu0 %v2235_v29 }
 0x144   : > { %772 = vmatprep.mubr.bf16.mxu0 %v2683_v3 }
 0x14b   : > { %773 = vmatmul.mubr.bf16.gmra.mrb[32].mxu0 %v2236_v30 }
 0x14c   : > { %782 = vmatprep.mubr.bf16.mxu0 %v2683_v3 }
 0x153   : > { %783 = vmatmul.mubr.bf16.gmra.mrb[36].mxu0 %v2237_v31 }
 0x154   : > { %792 = vmatprep.mubr.bf16.mxu0 %v2683_v3 }
 0x15b   : > { %793 = vmatmul.mubr.bf16.gmra.mrb[40].mxu0 %v2238_v32 }
 0x15c   : > { %802 = vmatprep.mubr.bf16.mxu0 %v2683_v3 }
 0x163   : > { %803 = vmatmul.mubr.bf16.gmra.mrb[44].mxu0 %v2239_v34 }
 0x164   : > { %812 = vmatprep.mubr.bf16.mxu0 %v2683_v3 }
 0x16b   : > { %813 = vmatmul.mubr.bf16.gmra.mrb[48].mxu0 %v2240_v39 }
 0x16c   : > { %822 = vmatprep.mubr.bf16.mxu0 %v2683_v3 }
 0x173   : > { %823 = vmatmul.mubr.bf16.gmra.mrb[52].mxu0 %v2241_v44 }
 0x174   : > { %832 = vmatprep.mubr.bf16.mxu0 %v2683_v3 }
 0x17b   : > { %833 = vmatmul.mubr.bf16.gmra.mrb[56].mxu0 %v2242_v48 }
 0x17c   : > { %842 = vmatprep.mubr.bf16.mxu0 %v2683_v3 }
 0x183   : > { %843 = vmatmul.mubr.bf16.gmra.mrb[60].mxu0 %v2243_v49 }
 0x1de   : > { %v694_v57 = vpop.f32.mrb[0].mxu0 }
 0x1df   : > { %v695_v58 = vadd.f32 %v694_v57, %v3149_v55  ;;  %v696_v59 = vpop.f32.mrb[1].mxu0 }
 0x1e0   : > { %v697_v60 = vadd.f32 %v696_v59, %v3151_v56  ;;  %v698_v61 = vpop.f32.mrb[2].mxu0 }
 0x1e1   : > { %v917_v62 = vmul.f32 0.70710677, %v695_v58  ;;  %v699_v63 = vadd.f32 %v698_v61, %v3149_v55  ;;  %v700_v0 = vpop.f32.mrb[3].mxu0  ;;  %v853_v21 = vmul.f32 0.5, %v695_v58 }
 0x1e2   : > { %v918_v1 = vmul.f32 0.70710677, %v697_v60  ;;  %v701_v2 = vadd.f32 %v700_v0, %v3151_v56  ;;  %v854_v31 = vmul.f32 0.5, %v697_v60 }
 0x1e3   : > { %2260 = verf.f32 %v917_v62  ;;  %v919_v3 = vmul.f32 0.70710677, %v699_v63  ;;  %v855_v26 = vmul.f32 0.5, %v699_v63 }
 0x1e4   : > { %2262 = verf.f32 %v918_v1  ;;  %v920_v4 = vmul.f32 0.70710677, %v701_v2  ;;  %v856_v37 = vmul.f32 0.5, %v701_v2 }
 0x1e5   : > { %2264 = verf.f32 %v919_v3 }
 0x1e6   : > { %2266 = verf.f32 %v920_v4  ;;  %v704_v5 = vpop.f32.mrb[4].mxu0 }
 0x1e7   : > { %v705_v6 = vadd.f32 %v704_v5, %v3149_v55  ;;  %v706_v7 = vpop.f32.mrb[5].mxu0 }
 0x1e8   : > { %v707_v8 = vadd.f32 %v706_v7, %v3151_v56  ;;  %v708_v9 = vpop.f32.mrb[6].mxu0 }
 0x1e9   : > { %v921_v10 = vmul.f32 0.70710677, %v705_v6  ;;  %v709_v11 = vadd.f32 %v708_v9, %v3149_v55  ;;  %v710_v12 = vpop.f32.mrb[7].mxu0  ;;  %v857_v58 = vmul.f32 0.5, %v705_v6 }
 0x1ea   : > { %v922_v13 = vmul.f32 0.70710677, %v707_v8  ;;  %v711_v14 = vadd.f32 %v710_v12, %v3151_v56  ;;  %v858_v63 = vmul.f32 0.5, %v707_v8 }
 0x1eb   : > { %2268 = verf.f32 %v921_v10  ;;  %v923_v15 = vmul.f32 0.70710677, %v709_v11  ;;  %v859_v59 = vmul.f32 0.5, %v709_v11 }
 0x1ec   : > { %2270 = verf.f32 %v922_v13  ;;  %v924_v16 = vmul.f32 0.70710677, %v711_v14  ;;  %v860_v0 = vmul.f32 0.5, %v711_v14 }
 0x1ed   : > { %v2261_v17 = vpop.eup %2260  ;;  %2272 = verf.f32 %v923_v15 }
 0x1ee   : > { %v2263_v18 = vpop.eup %2262  ;;  %2274 = verf.f32 %v924_v16  ;;  %v714_v19 = vpop.f32.mrb[8].mxu0  ;;  %v1045_v22 = vadd.f32 1.0, %v2261_v17 }
 0x1ef   : > { %v2265_v20 = vpop.eup %2264  ;;  %v3162_v23 = vadd.f32 %v714_v19, %v3149_v55  ;;  %v716_v24 = vpop.f32.mrb[9].mxu0  ;;  %v1046_v30 = vadd.f32 1.0, %v2263_v18 }
 0x1f0   : > { %v2267_v25 = vpop.eup %2266  ;;  %v1047_v27 = vadd.f32 1.0, %v2265_v20  ;;  %v3165_v28 = vadd.f32 %v716_v24, %v3151_v56  ;;  %v718_v29 = vpop.f32.mrb[10].mxu0  ;;  %v1109_v40 = vmul.f32 %v1045_v22, %v853_v21 }
 0x1f1   : > { %v925_v32 = vmul.f32 0.70710677, %v3162_v23  ;;  %v3169_v33 = vadd.f32 %v718_v29, %v3149_v55  ;;  %v720_v34 = vpop.f32.mrb[11].mxu0  ;;  %v1048_v35 = vadd.f32 1.0, %v2267_v25  ;;  %v1110_v43 = vmul.f32 %v1046_v30, %v854_v31 }
 0x1f2   : > { %v1111_v36 = vmul.f32 %v1047_v27, %v855_v26  ;;  %v926_v38 = vmul.f32 0.70710677, %v3165_v28  ;;  %v3173_v39 = vadd.f32 %v720_v34, %v3151_v56  ;;  %v861_v25 = vmul.f32 0.5, %v3162_v23 }
 0x1f3   : > { %2276 = verf.f32 %v925_v32  ;;  %v927_v41 = vmul.f32 0.70710677, %v3169_v33  ;;  %v1112_v44 = vmul.f32 %v1048_v35, %v856_v37  ;;  %v863_v26 = vmul.f32 0.5, %v3169_v33 }
 0x1f4   : > { %2278 = verf.f32 %v926_v38  ;;  %v928_v42 = vmul.f32 0.70710677, %v3173_v39  ;;  %v1205_v46 = vpack.c.bf16 %v1111_v36, %v1109_v40  ;;  %v862_v31 = vmul.f32 0.5, %v3165_v28 }
 0x1f5   : > { %v2269_v45 = vpop.eup %2268  ;;  %2280 = verf.f32 %v927_v41  ;;  %v1206_v50 = vpack.c.bf16 %v1112_v44, %v1110_v43  ;;  %v864_v32 = vmul.f32 0.5, %v3173_v39 }
 0x1f6   : > { %v2271_v47 = vpop.eup %2270  ;;  %v1049_v48 = vadd.f32 1.0, %v2269_v45  ;;  %2282 = verf.f32 %v928_v42  ;;  %v724_v49 = vpop.f32.mrb[12].mxu0 }
 0x1f7   : > { %v2273_v51 = vpop.eup %2272  ;;  %v1050_v52 = vadd.f32 1.0, %v2271_v47  ;;  %v3178_v53 = vadd.f32 %v724_v49, %v3149_v55  ;;  %v726_v54 = vpop.f32.mrb[13].mxu0  ;;  %1397 = vmatprep.mubr.bf16.mxu1 %v1206_v50 }
 0x1f8   : > { %v2275_v57 = vpop.eup %2274  ;;  %v1051_v60 = vadd.f32 1.0, %v2273_v51  ;;  %v3181_v61 = vadd.f32 %v726_v54, %v3151_v56  ;;  %v728_v62 = vpop.f32.mrb[14].mxu0  ;;  %1398 = vmatmul.mubr.bf16.vlgmr.msra.gmra.mrb[0].mxu1 %v1205_v46  ;;  %v1113_v4 = vmul.f32 %v1049_v48, %v857_v58 }
 0x1f9   : > { %v1052_v1 = vadd.f32 1.0, %v2275_v57  ;;  %v929_v2 = vmul.f32 0.70710677, %v3178_v53  ;;  %v730_v3 = vpop.f32.mrb[15].mxu0  ;;  %v729_v6 = vadd.f32 %v728_v62, %v3149_v55  ;;  %v1114_v9 = vmul.f32 %v1050_v52, %v858_v63 }
 0x1fa   : > { %v1115_v5 = vmul.f32 %v1051_v60, %v859_v59  ;;  %v930_v7 = vmul.f32 0.70710677, %v3181_v61  ;;  %v731_v11 = vadd.f32 %v730_v3, %v3151_v56  ;;  %v865_v52 = vmul.f32 0.5, %v3178_v53 }
 0x1fb   : > { %v1116_v10 = vmul.f32 %v1052_v1, %v860_v0  ;;  %2284 = verf.f32 %v929_v2  ;;  %v931_v12 = vmul.f32 0.70710677, %v729_v6  ;;  %v866_v60 = vmul.f32 0.5, %v3181_v61 }
 0x1fc   : > { %2286 = verf.f32 %v930_v7  ;;  %v1207_v8 = vpack.c.bf16 %v1115_v5, %v1113_v4  ;;  %v932_v14 = vmul.f32 0.70710677, %v731_v11  ;;  %v867_v62 = vmul.f32 0.5, %v729_v6 }
 0x1fd   : > { %v2277_v13 = vpop.eup %2276  ;;  %v1208_v15 = vpack.c.bf16 %v1116_v10, %v1114_v9  ;;  %2288 = verf.f32 %v931_v12  ;;  %v868_v2 = vmul.f32 0.5, %v731_v11 }
 0x1fe   : > { %v2279_v16 = vpop.eup %2278  ;;  %v1053_v17 = vadd.f32 1.0, %v2277_v13  ;;  %v734_v18 = vpop.f32.mrb[16].mxu0  ;;  %2290 = verf.f32 %v932_v14 }
 0x1ff   : > { %v2281_v19 = vpop.eup %2280  ;;  %v1054_v20 = vadd.f32 1.0, %v2279_v16  ;;  %v3188_v21 = vadd.f32 %v734_v18, %v3149_v55  ;;  %v736_v22 = vpop.f32.mrb[17].mxu0  ;;  %1405 = vmatprep.mubr.bf16.mxu1 %v1208_v15 }
 0x200   : > { %v2283_v24 = vpop.eup %2282  ;;  %v1055_v27 = vadd.f32 1.0, %v2281_v19  ;;  %v3193_v29 = vadd.f32 %v736_v22, %v3151_v56  ;;  %v738_v30 = vpop.f32.mrb[18].mxu0  ;;  %1406 = vmatmul.mubr.bf16.gmra.mrb[4].mxu1 %v1207_v8  ;;  %v1117_v37 = vmul.f32 %v1053_v17, %v861_v25 }
 0x201   : > { %v1056_v34 = vadd.f32 1.0, %v2283_v24  ;;  %v933_v35 = vmul.f32 0.70710677, %v3188_v21  ;;  %v740_v36 = vpop.f32.mrb[19].mxu0  ;;  %v739_v33 = vadd.f32 %v738_v30, %v3149_v55  ;;  %v1118_v40 = vmul.f32 %v1054_v20, %v862_v31 }
 0x202   : > { %v1119_v38 = vmul.f32 %v1055_v27, %v863_v26  ;;  %v934_v23 = vmul.f32 0.70710677, %v3193_v29  ;;  %v741_v42 = vadd.f32 %v740_v36, %v3151_v56  ;;  %v869_v20 = vmul.f32 0.5, %v3188_v21 }
 0x203   : > { %v1120_v41 = vmul.f32 %v1056_v34, %v864_v32  ;;  %2292 = verf.f32 %v933_v35  ;;  %v935_v28 = vmul.f32 0.70710677, %v739_v33  ;;  %v870_v27 = vmul.f32 0.5, %v3193_v29 }
 0x204   : > { %2294 = verf.f32 %v934_v23  ;;  %v1209_v43 = vpack.c.bf16 %v1119_v38, %v1117_v37  ;;  %v936_v44 = vmul.f32 0.70710677, %v741_v42  ;;  %v871_v30 = vmul.f32 0.5, %v739_v33 }
 0x205   : > { %v2285_v39 = vpop.eup %2284  ;;  %v1210_v45 = vpack.c.bf16 %v1120_v41, %v1118_v40  ;;  %2296 = verf.f32 %v935_v28  ;;  %v872_v35 = vmul.f32 0.5, %v741_v42 }
 0x206   : > { %v2287_v46 = vpop.eup %2286  ;;  %v744_v47 = vpop.f32.mrb[20].mxu0  ;;  %v1057_v48 = vadd.f32 1.0, %v2285_v39  ;;  %2298 = verf.f32 %v936_v44 }
 0x207   : > { %v3202_v49 = vadd.f32 %v744_v47, %v3149_v55  ;;  %v746_v50 = vpop.f32.mrb[21].mxu0  ;;  %1413 = vmatprep.mubr.bf16.mxu1 %v1210_v45  ;;  %v2289_v51 = vpop.eup %2288  ;;  %v1058_v54 = vadd.f32 1.0, %v2287_v46 }
 0x208   : > { %v3206_v57 = vadd.f32 %v746_v50, %v3151_v56  ;;  %v748_v58 = vpop.f32.mrb[22].mxu0  ;;  %v2291_v59 = vpop.eup %2290  ;;  %v1059_v63 = vadd.f32 1.0, %v2289_v51  ;;  %1414 = vmatmul.mubr.bf16.gmra.mrb[8].mxu1 %v1209_v43  ;;  %v1121_v5 = vmul.f32 %v1057_v48, %v865_v52 }
 0x209   : > { %v937_v0 = vmul.f32 0.70710677, %v3202_v49  ;;  %v750_v1 = vpop.f32.mrb[23].mxu0  ;;  %v1060_v3 = vadd.f32 1.0, %v2291_v59  ;;  %v3212_v53 = vadd.f32 %v748_v58, %v3149_v55  ;;  %v1122_v61 = vmul.f32 %v1058_v54, %v866_v60 }
 0x20a   : > { %v938_v4 = vmul.f32 0.70710677, %v3206_v57  ;;  %v1123_v7 = vmul.f32 %v1059_v63, %v867_v62  ;;  %v3215_v9 = vadd.f32 %v750_v1, %v3151_v56  ;;  %v873_v51 = vmul.f32 0.5, %v3202_v49 }
 0x20b   : > { %2300 = verf.f32 %v937_v0  ;;  %v1124_v6 = vmul.f32 %v1060_v3, %v868_v2  ;;  %v939_v10 = vmul.f32 0.70710677, %v3212_v53  ;;  %v874_v60 = vmul.f32 0.5, %v3206_v57 }
 0x20c   : > { %2302 = verf.f32 %v938_v4  ;;  %v940_v11 = vmul.f32 0.70710677, %v3215_v9  ;;  %v1211_v8 = vpack.c.bf16 %v1123_v7, %v1121_v5  ;;  %v875_v62 = vmul.f32 0.5, %v3212_v53 }
 0x20d   : > { %v2293_v12 = vpop.eup %2292  ;;  %2304 = verf.f32 %v939_v10  ;;  %v1212_v15 = vpack.c.bf16 %v1124_v6, %v1122_v61  ;;  %v876_v2 = vmul.f32 0.5, %v3215_v9 }
 0x20e   : > { %v2295_v13 = vpop.eup %2294  ;;  %v754_v14 = vpop.f32.mrb[24].mxu0  ;;  %v1061_v16 = vadd.f32 1.0, %v2293_v12  ;;  %2306 = verf.f32 %v940_v11 }
 0x20f   : > { %v3220_v17 = vadd.f32 %v754_v14, %v3149_v55  ;;  %v756_v18 = vpop.f32.mrb[25].mxu0  ;;  %v2297_v19 = vpop.eup %2296  ;;  %v1062_v22 = vadd.f32 1.0, %v2295_v13  ;;  %1421 = vmatprep.mubr.bf16.mxu1 %v1212_v15 }
 0x210   : > { %v3224_v24 = vadd.f32 %v756_v18, %v3151_v56  ;;  %v758_v25 = vpop.f32.mrb[26].mxu0  ;;  %v2299_v26 = vpop.eup %2298  ;;  %v1063_v31 = vadd.f32 1.0, %v2297_v19  ;;  %1422 = vmatmul.mubr.bf16.gmra.mrb[12].mxu1 %v1211_v8  ;;  %v1125_v38 = vmul.f32 %v1061_v16, %v869_v20 }
 0x211   : > { %v941_v32 = vmul.f32 0.70710677, %v3220_v17  ;;  %v760_v34 = vpop.f32.mrb[27].mxu0  ;;  %v1064_v36 = vadd.f32 1.0, %v2299_v26  ;;  %v3230_v21 = vadd.f32 %v758_v25, %v3149_v55  ;;  %v1126_v29 = vmul.f32 %v1062_v22, %v870_v27 }
 0x212   : > { %v942_v37 = vmul.f32 0.70710677, %v3224_v24  ;;  %v1127_v23 = vmul.f32 %v1063_v31, %v871_v30  ;;  %v3233_v40 = vadd.f32 %v760_v34, %v3151_v56  ;;  %v877_v19 = vmul.f32 0.5, %v3220_v17 }
 0x213   : > { %2308 = verf.f32 %v941_v32  ;;  %v1128_v33 = vmul.f32 %v1064_v36, %v872_v35  ;;  %v943_v41 = vmul.f32 0.70710677, %v3230_v21  ;;  %v878_v27 = vmul.f32 0.5, %v3224_v24 }
 0x214   : > { %2310 = verf.f32 %v942_v37  ;;  %v944_v42 = vmul.f32 0.70710677, %v3233_v40  ;;  %v1213_v43 = vpack.c.bf16 %v1127_v23, %v1125_v38  ;;  %v879_v30 = vmul.f32 0.5, %v3230_v21 }
 0x215   : > { %v2301_v28 = vpop.eup %2300  ;;  %2312 = verf.f32 %v943_v41  ;;  %v1214_v45 = vpack.c.bf16 %v1128_v33, %v1126_v29  ;;  %v880_v35 = vmul.f32 0.5, %v3233_v40 }
 0x216   : > { %v2303_v39 = vpop.eup %2302  ;;  %v764_v44 = vpop.f32.mrb[28].mxu0  ;;  %v1065_v46 = vadd.f32 1.0, %v2301_v28  ;;  %2314 = verf.f32 %v944_v42 }
 0x217   : > { %v3238_v47 = vadd.f32 %v764_v44, %v3149_v55  ;;  %v766_v48 = vpop.f32.mrb[29].mxu0  ;;  %v2305_v50 = vpop.eup %2304  ;;  %v1066_v52 = vadd.f32 1.0, %v2303_v39  ;;  %1429 = vmatprep.mubr.bf16.mxu1 %v1214_v45 }
 0x218   : > { %v3242_v54 = vadd.f32 %v766_v48, %v3151_v56  ;;  %v768_v58 = vpop.f32.mrb[30].mxu0  ;;  %v2307_v59 = vpop.eup %2306  ;;  %v1067_v63 = vadd.f32 1.0, %v2305_v50  ;;  %1430 = vmatmul.mubr.bf16.gmra.mrb[16].mxu1 %v1213_v43  ;;  %v1129_v5 = vmul.f32 %v1065_v46, %v873_v51 }
 0x219   : > { %v945_v0 = vmul.f32 0.70710677, %v3238_v47  ;;  %v770_v1 = vpop.f32.mrb[31].mxu0  ;;  %v1068_v3 = vadd.f32 1.0, %v2307_v59  ;;  %v3250_v4 = vadd.f32 %v768_v58, %v3149_v55  ;;  %v1130_v53 = vmul.f32 %v1066_v52, %v874_v60 }
 0x21a   : > { %v946_v49 = vmul.f32 0.70710677, %v3242_v54  ;;  %v1131_v7 = vmul.f32 %v1067_v63, %v875_v62  ;;  %v3253_v57 = vadd.f32 %v770_v1, %v3151_v56  ;;  %v881_v50 = vmul.f32 0.5, %v3238_v47 }
 0x21b   : > { %2316 = verf.f32 %v945_v0  ;;  %v1132_v61 = vmul.f32 %v1068_v3, %v876_v2  ;;  %v947_v6 = vmul.f32 0.70710677, %v3250_v4  ;;  %v882_v60 = vmul.f32 0.5, %v3242_v54 }
 0x21c   : > { %2318 = verf.f32 %v946_v49  ;;  %v948_v9 = vmul.f32 0.70710677, %v3253_v57  ;;  %v1215_v12 = vpack.c.bf16 %v1131_v7, %v1129_v5  ;;  %v883_v62 = vmul.f32 0.5, %v3250_v4 }
 0x21d   : > { %v2309_v10 = vpop.eup %2308  ;;  %2320 = verf.f32 %v947_v6  ;;  %v1216_v13 = vpack.c.bf16 %v1132_v61, %v1130_v53  ;;  %v884_v2 = vmul.f32 0.5, %v3253_v57 }
 0x21e   : > { %v2311_v11 = vpop.eup %2310  ;;  %v774_v8 = vpop.f32.mrb[32].mxu0  ;;  %v1069_v14 = vadd.f32 1.0, %v2309_v10  ;;  %2322 = verf.f32 %v948_v9 }
 0x21f   : > { %v3258_v15 = vadd.f32 %v774_v8, %v3149_v55  ;;  %v776_v16 = vpop.f32.mrb[33].mxu0  ;;  %v2313_v18 = vpop.eup %2312  ;;  %v1070_v20 = vadd.f32 1.0, %v2311_v11  ;;  %1437 = vmatprep.mubr.bf16.mxu1 %v1216_v13 }
 0x220   : > { %v3262_v22 = vadd.f32 %v776_v16, %v3151_v56  ;;  %v778_v25 = vpop.f32.mrb[34].mxu0  ;;  %v2315_v26 = vpop.eup %2314  ;;  %v1071_v31 = vadd.f32 1.0, %v2313_v18  ;;  %1438 = vmatmul.mubr.bf16.gmra.mrb[20].mxu1 %v1215_v12  ;;  %v1133_v38 = vmul.f32 %v1069_v14, %v877_v19 }
 0x221   : > { %v949_v32 = vmul.f32 0.70710677, %v3258_v15  ;;  %v780_v34 = vpop.f32.mrb[35].mxu0  ;;  %v1072_v36 = vadd.f32 1.0, %v2315_v26  ;;  %v3270_v37 = vadd.f32 %v778_v25, %v3149_v55  ;;  %v1134_v21 = vmul.f32 %v1070_v20, %v878_v27 }
 0x222   : > { %v950_v17 = vmul.f32 0.70710677, %v3262_v22  ;;  %v1135_v23 = vmul.f32 %v1071_v31, %v879_v30  ;;  %v3273_v24 = vadd.f32 %v780_v34, %v3151_v56  ;;  %v885_v18 = vmul.f32 0.5, %v3258_v15 }
 0x223   : > { %2324 = verf.f32 %v949_v32  ;;  %v1136_v29 = vmul.f32 %v1072_v36, %v880_v35  ;;  %v951_v33 = vmul.f32 0.70710677, %v3270_v37  ;;  %v886_v27 = vmul.f32 0.5, %v3262_v22 }
 0x224   : > { %2326 = verf.f32 %v950_v17  ;;  %v952_v40 = vmul.f32 0.70710677, %v3273_v24  ;;  %v1217_v28 = vpack.c.bf16 %v1135_v23, %v1133_v38  ;;  %v887_v30 = vmul.f32 0.5, %v3270_v37 }
 0x225   : > { %v2317_v41 = vpop.eup %2316  ;;  %2328 = verf.f32 %v951_v33  ;;  %v1218_v39 = vpack.c.bf16 %v1136_v29, %v1134_v21  ;;  %v888_v35 = vmul.f32 0.5, %v3273_v24 }
 0x226   : > { %v2319_v42 = vpop.eup %2318  ;;  %v784_v43 = vpop.f32.mrb[36].mxu0  ;;  %v1073_v44 = vadd.f32 1.0, %v2317_v41  ;;  %2330 = verf.f32 %v952_v40 }
 0x227   : > { %v3278_v45 = vadd.f32 %v784_v43, %v3149_v55  ;;  %v786_v46 = vpop.f32.mrb[37].mxu0  ;;  %v2321_v48 = vpop.eup %2320  ;;  %v1074_v51 = vadd.f32 1.0, %v2319_v42  ;;  %1445 = vmatprep.mubr.bf16.mxu1 %v1218_v39 }
 0x228   : > { %v3282_v52 = vadd.f32 %v786_v46, %v3151_v56  ;;  %v788_v58 = vpop.f32.mrb[38].mxu0  ;;  %v2323_v59 = vpop.eup %2322  ;;  %v1075_v63 = vadd.f32 1.0, %v2321_v48  ;;  %1446 = vmatmul.mubr.bf16.gmra.mrb[24].mxu1 %v1217_v28  ;;  %v1137_v5 = vmul.f32 %v1073_v44, %v881_v50 }
 0x229   : > { %v953_v0 = vmul.f32 0.70710677, %v3278_v45  ;;  %v790_v1 = vpop.f32.mrb[39].mxu0  ;;  %v1076_v3 = vadd.f32 1.0, %v2323_v59  ;;  %v3290_v49 = vadd.f32 %v788_v58, %v3149_v55  ;;  %v1138_v4 = vmul.f32 %v1074_v51, %v882_v60 }
 0x22a   : > { %v954_v47 = vmul.f32 0.70710677, %v3282_v52  ;;  %v1139_v7 = vmul.f32 %v1075_v63, %v883_v62  ;;  %v3293_v54 = vadd.f32 %v790_v1, %v3151_v56  ;;  %v889_v48 = vmul.f32 0.5, %v3278_v45 }
 0x22b   : > { %2332 = verf.f32 %v953_v0  ;;  %v1140_v53 = vmul.f32 %v1076_v3, %v884_v2  ;;  %v955_v61 = vmul.f32 0.70710677, %v3290_v49  ;;  %v890_v60 = vmul.f32 0.5, %v3282_v52 }
 0x22c   : > { %2334 = verf.f32 %v954_v47  ;;  %v956_v57 = vmul.f32 0.70710677, %v3293_v54  ;;  %v1219_v10 = vpack.c.bf16 %v1139_v7, %v1137_v5  ;;  %v891_v62 = vmul.f32 0.5, %v3290_v49 }
 0x22d   : > { %v2325_v6 = vpop.eup %2324  ;;  %2336 = verf.f32 %v955_v61  ;;  %v1220_v11 = vpack.c.bf16 %v1140_v53, %v1138_v4  ;;  %v892_v2 = vmul.f32 0.5, %v3293_v54 }
 0x22e   : > { %v2327_v9 = vpop.eup %2326  ;;  %v794_v12 = vpop.f32.mrb[40].mxu0  ;;  %v1077_v8 = vadd.f32 1.0, %v2325_v6  ;;  %2338 = verf.f32 %v956_v57 }
 0x22f   : > { %v3298_v13 = vadd.f32 %v794_v12, %v3149_v55  ;;  %v796_v14 = vpop.f32.mrb[41].mxu0  ;;  %v2329_v16 = vpop.eup %2328  ;;  %v1078_v19 = vadd.f32 1.0, %v2327_v9  ;;  %1453 = vmatprep.mubr.bf16.mxu1 %v1220_v11 }
 0x230   : > { %v3302_v20 = vadd.f32 %v796_v14, %v3151_v56  ;;  %v798_v25 = vpop.f32.mrb[42].mxu0  ;;  %v2331_v26 = vpop.eup %2330  ;;  %v1079_v31 = vadd.f32 1.0, %v2329_v16  ;;  %1454 = vmatmul.mubr.bf16.gmra.mrb[28].mxu1 %v1219_v10  ;;  %v1141_v38 = vmul.f32 %v1077_v8, %v885_v18 }
 0x231   : > { %v957_v32 = vmul.f32 0.70710677, %v3298_v13  ;;  %v800_v34 = vpop.f32.mrb[43].mxu0  ;;  %v1080_v36 = vadd.f32 1.0, %v2331_v26  ;;  %v3310_v17 = vadd.f32 %v798_v25, %v3149_v55  ;;  %v1142_v37 = vmul.f32 %v1078_v19, %v886_v27 }
 0x232   : > { %v958_v15 = vmul.f32 0.70710677, %v3302_v20  ;;  %v1143_v23 = vmul.f32 %v1079_v31, %v887_v30  ;;  %v3313_v22 = vadd.f32 %v800_v34, %v3151_v56  ;;  %v893_v16 = vmul.f32 0.5, %v3298_v13 }
 0x233   : > { %2340 = verf.f32 %v957_v32  ;;  %v1144_v21 = vmul.f32 %v1080_v36, %v888_v35  ;;  %v959_v29 = vmul.f32 0.70710677, %v3310_v17  ;;  %v894_v27 = vmul.f32 0.5, %v3302_v20 }
 0x234   : > { %2342 = verf.f32 %v958_v15  ;;  %v960_v24 = vmul.f32 0.70710677, %v3313_v22  ;;  %v1221_v41 = vpack.c.bf16 %v1143_v23, %v1141_v38  ;;  %v895_v30 = vmul.f32 0.5, %v3310_v17 }
 0x235   : > { %v2333_v33 = vpop.eup %2332  ;;  %2344 = verf.f32 %v959_v29  ;;  %v1222_v42 = vpack.c.bf16 %v1144_v21, %v1142_v37  ;;  %v896_v35 = vmul.f32 0.5, %v3313_v22 }
 0x236   : > { %v2335_v40 = vpop.eup %2334  ;;  %v804_v28 = vpop.f32.mrb[44].mxu0  ;;  %v1081_v43 = vadd.f32 1.0, %v2333_v33  ;;  %2346 = verf.f32 %v960_v24 }
 0x237   : > { %v3318_v39 = vadd.f32 %v804_v28, %v3149_v55  ;;  %v806_v44 = vpop.f32.mrb[45].mxu0  ;;  %v2337_v46 = vpop.eup %2336  ;;  %v1082_v50 = vadd.f32 1.0, %v2335_v40  ;;  %1461 = vmatprep.mubr.bf16.mxu1 %v1222_v42 }
 0x238   : > { %v3322_v51 = vadd.f32 %v806_v44, %v3151_v56  ;;  %v808_v58 = vpop.f32.mrb[46].mxu0  ;;  %v2339_v59 = vpop.eup %2338  ;;  %v1083_v63 = vadd.f32 1.0, %v2337_v46  ;;  %1462 = vmatmul.mubr.bf16.gmra.mrb[32].mxu1 %v1221_v41  ;;  %v1145_v5 = vmul.f32 %v1081_v43, %v889_v48 }
 0x239   : > { %v961_v0 = vmul.f32 0.70710677, %v3318_v39  ;;  %v810_v1 = vpop.f32.mrb[47].mxu0  ;;  %v1084_v3 = vadd.f32 1.0, %v2339_v59  ;;  %v3330_v47 = vadd.f32 %v808_v58, %v3149_v55  ;;  %v1146_v49 = vmul.f32 %v1082_v50, %v890_v60 }
 0x23a   : > { %v962_v45 = vmul.f32 0.70710677, %v3322_v51  ;;  %v1147_v7 = vmul.f32 %v1083_v63, %v891_v62  ;;  %v3333_v52 = vadd.f32 %v810_v1, %v3151_v56  ;;  %v897_v46 = vmul.f32 0.5, %v3318_v39 }
 0x23b   : > { %2348 = verf.f32 %v961_v0  ;;  %v1148_v4 = vmul.f32 %v1084_v3, %v892_v2  ;;  %v963_v53 = vmul.f32 0.70710677, %v3330_v47  ;;  %v898_v60 = vmul.f32 0.5, %v3322_v51 }
 0x23c   : > { %2350 = verf.f32 %v962_v45  ;;  %v964_v54 = vmul.f32 0.70710677, %v3333_v52  ;;  %v1223_v6 = vpack.c.bf16 %v1147_v7, %v1145_v5  ;;  %v899_v62 = vmul.f32 0.5, %v3330_v47 }
 0x23d   : > { %v2341_v61 = vpop.eup %2340  ;;  %2352 = verf.f32 %v963_v53  ;;  %v1224_v9 = vpack.c.bf16 %v1148_v4, %v1146_v49  ;;  %v900_v2 = vmul.f32 0.5, %v3333_v52 }
 0x23e   : > { %v2343_v57 = vpop.eup %2342  ;;  %v814_v10 = vpop.f32.mrb[48].mxu0  ;;  %v1085_v12 = vadd.f32 1.0, %v2341_v61  ;;  %2354 = verf.f32 %v964_v54 }
 0x23f   : > { %v3338_v11 = vadd.f32 %v814_v10, %v3149_v55  ;;  %v816_v8 = vpop.f32.mrb[49].mxu0  ;;  %v2345_v14 = vpop.eup %2344  ;;  %v1086_v18 = vadd.f32 1.0, %v2343_v57  ;;  %1469 = vmatprep.mubr.bf16.mxu1 %v1224_v9 }
 0x240   : > { %v3342_v19 = vadd.f32 %v816_v8, %v3151_v56  ;;  %v818_v25 = vpop.f32.mrb[50].mxu0  ;;  %v2347_v26 = vpop.eup %2346  ;;  %v1087_v31 = vadd.f32 1.0, %v2345_v14  ;;  %1470 = vmatmul.mubr.bf16.gmra.mrb[36].mxu1 %v1223_v6  ;;  %v1149_v38 = vmul.f32 %v1085_v12, %v893_v16 }
 0x241   : > { %v965_v32 = vmul.f32 0.70710677, %v3338_v11  ;;  %v820_v34 = vpop.f32.mrb[51].mxu0  ;;  %v1088_v36 = vadd.f32 1.0, %v2347_v26  ;;  %v3350_v15 = vadd.f32 %v818_v25, %v3149_v55  ;;  %v1150_v17 = vmul.f32 %v1086_v18, %v894_v27 }
 0x242   : > { %v966_v13 = vmul.f32 0.70710677, %v3342_v19  ;;  %v1151_v23 = vmul.f32 %v1087_v31, %v895_v30  ;;  %v3353_v20 = vadd.f32 %v820_v34, %v3151_v56  ;;  %v901_v14 = vmul.f32 0.5, %v3338_v11 }
 0x243   : > { %2356 = verf.f32 %v965_v32  ;;  %v1152_v37 = vmul.f32 %v1088_v36, %v896_v35  ;;  %v967_v21 = vmul.f32 0.70710677, %v3350_v15  ;;  %v902_v27 = vmul.f32 0.5, %v3342_v19 }
 0x244   : > { %2358 = verf.f32 %v966_v13  ;;  %v968_v22 = vmul.f32 0.70710677, %v3353_v20  ;;  %v1225_v33 = vpack.c.bf16 %v1151_v23, %v1149_v38  ;;  %v903_v30 = vmul.f32 0.5, %v3350_v15 }
 0x245   : > { %v2349_v29 = vpop.eup %2348  ;;  %2360 = verf.f32 %v967_v21  ;;  %v1226_v40 = vpack.c.bf16 %v1152_v37, %v1150_v17  ;;  %v904_v35 = vmul.f32 0.5, %v3353_v20 }
 0x246   : > { %v2351_v24 = vpop.eup %2350  ;;  %v824_v41 = vpop.f32.mrb[52].mxu0  ;;  %v1089_v28 = vadd.f32 1.0, %v2349_v29  ;;  %2362 = verf.f32 %v968_v22 }
 0x247   : > { %v3358_v42 = vadd.f32 %v824_v41, %v3149_v55  ;;  %v826_v43 = vpop.f32.mrb[53].mxu0  ;;  %v2353_v44 = vpop.eup %2352  ;;  %v1090_v48 = vadd.f32 1.0, %v2351_v24  ;;  %1477 = vmatprep.mubr.bf16.mxu1 %v1226_v40 }
 0x248   : > { %v3362_v50 = vadd.f32 %v826_v43, %v3151_v56  ;;  %v828_v58 = vpop.f32.mrb[54].mxu0  ;;  %v2355_v59 = vpop.eup %2354  ;;  %v1091_v63 = vadd.f32 1.0, %v2353_v44  ;;  %1478 = vmatmul.mubr.bf16.gmra.mrb[40].mxu1 %v1225_v33  ;;  %v1153_v5 = vmul.f32 %v1089_v28, %v897_v46 }
 0x249   : > { %v969_v0 = vmul.f32 0.70710677, %v3358_v42  ;;  %v830_v1 = vpop.f32.mrb[55].mxu0  ;;  %v1092_v3 = vadd.f32 1.0, %v2355_v59  ;;  %v3370_v45 = vadd.f32 %v828_v58, %v3149_v55  ;;  %v1154_v47 = vmul.f32 %v1090_v48, %v898_v60 }
 0x24a   : > { %v970_v39 = vmul.f32 0.70710677, %v3362_v50  ;;  %v1155_v7 = vmul.f32 %v1091_v63, %v899_v62  ;;  %v3373_v51 = vadd.f32 %v830_v1, %v3151_v56  ;;  %v905_v44 = vmul.f32 0.5, %v3358_v42 }
 0x24b   : > { %2364 = verf.f32 %v969_v0  ;;  %v1156_v49 = vmul.f32 %v1092_v3, %v900_v2  ;;  %v971_v4 = vmul.f32 0.70710677, %v3370_v45  ;;  %v906_v60 = vmul.f32 0.5, %v3362_v50 }
 0x24c   : > { %2366 = verf.f32 %v970_v39  ;;  %v972_v52 = vmul.f32 0.70710677, %v3373_v51  ;;  %v1227_v61 = vpack.c.bf16 %v1155_v7, %v1153_v5  ;;  %v907_v62 = vmul.f32 0.5, %v3370_v45 }
 0x24d   : > { %v2357_v53 = vpop.eup %2356  ;;  %2368 = verf.f32 %v971_v4  ;;  %v1228_v57 = vpack.c.bf16 %v1156_v49, %v1154_v47  ;;  %v908_v2 = vmul.f32 0.5, %v3373_v51 }
 0x24e   : > { %v2359_v54 = vpop.eup %2358  ;;  %v834_v6 = vpop.f32.mrb[56].mxu0  ;;  %v1093_v10 = vadd.f32 1.0, %v2357_v53  ;;  %2370 = verf.f32 %v972_v52 }
 0x24f   : > { %v3378_v9 = vadd.f32 %v834_v6, %v3149_v55  ;;  %v836_v12 = vpop.f32.mrb[57].mxu0  ;;  %v2361_v8 = vpop.eup %2360  ;;  %v1094_v16 = vadd.f32 1.0, %v2359_v54  ;;  %1485 = vmatprep.mubr.bf16.mxu1 %v1228_v57 }
 0x250   : > { %v3382_v18 = vadd.f32 %v836_v12, %v3151_v56  ;;  %v838_v25 = vpop.f32.mrb[58].mxu0  ;;  %v2363_v26 = vpop.eup %2362  ;;  %v1095_v31 = vadd.f32 1.0, %v2361_v8  ;;  %1486 = vmatmul.mubr.bf16.gmra.mrb[44].mxu1 %v1227_v61  ;;  %v1157_v38 = vmul.f32 %v1093_v10, %v901_v14 }
 0x251   : > { %v973_v32 = vmul.f32 0.70710677, %v3378_v9  ;;  %v840_v34 = vpop.f32.mrb[59].mxu0  ;;  %v1096_v36 = vadd.f32 1.0, %v2363_v26  ;;  %v839_v13 = vadd.f32 %v838_v25, %v3149_v55  ;;  %v1158_v19 = vmul.f32 %v1094_v16, %v902_v27 }
 0x252   : > { %v974_v11 = vmul.f32 0.70710677, %v3382_v18  ;;  %v1159_v23 = vmul.f32 %v1095_v31, %v903_v30  ;;  %v841_v17 = vadd.f32 %v840_v34, %v3151_v56  ;;  %v909_v10 = vmul.f32 0.5, %v3378_v9 }
 0x253   : > { %2372 = verf.f32 %v973_v32  ;;  %v1160_v37 = vmul.f32 %v1096_v36, %v904_v35  ;;  %v975_v15 = vmul.f32 0.70710677, %v839_v13  ;;  %v911_v12 = vmul.f32 0.5, %v839_v13 }
 0x254   : > { %2374 = verf.f32 %v974_v11  ;;  %v976_v29 = vmul.f32 0.70710677, %v841_v17  ;;  %v1229_v22 = vpack.c.bf16 %v1159_v23, %v1157_v38  ;;  %v910_v8 = vmul.f32 0.5, %v3382_v18 }
 0x255   : > { %v2365_v21 = vpop.eup %2364  ;;  %2376 = verf.f32 %v975_v15  ;;  %v1230_v24 = vpack.c.bf16 %v1160_v37, %v1158_v19  ;;  %v912_v14 = vmul.f32 0.5, %v841_v17 }
 0x256   : > { %v2367_v33 = vpop.eup %2366  ;;  %v844_v20 = vpop.f32.mrb[60].mxu0  ;;  %v1097_v41 = vadd.f32 1.0, %v2365_v21  ;;  %2378 = verf.f32 %v976_v29 }
 0x257   : > { %v845_v40 = vadd.f32 %v844_v20, %v3149_v55  ;;  %v846_v28 = vpop.f32.mrb[61].mxu0  ;;  %v2369_v43 = vpop.eup %2368  ;;  %v1098_v46 = vadd.f32 1.0, %v2367_v33  ;;  %1493 = vmatprep.mubr.bf16.mxu1 %v1230_v24 }
 0x258   : > { %v847_v48 = vadd.f32 %v846_v28, %v3151_v56  ;;  %v848_v58 = vpop.f32.mrb[62].mxu0  ;;  %v2371_v59 = vpop.eup %2370  ;;  %v1099_v63 = vadd.f32 1.0, %v2369_v43  ;;  %1494 = vmatmul.mubr.bf16.gmra.mrb[48].mxu1 %v1229_v22  ;;  %v1161_v5 = vmul.f32 %v1097_v41, %v905_v44  ;;  %v1173_v41 = vld [vmem:[#allocation2] sm:$0xff] }
 0x259   : > { %v977_v0 = vmul.f32 0.70710677, %v845_v40  ;;  %v850_v1 = vpop.f32.mrb[63].mxu0  ;;  %v1100_v3 = vadd.f32 1.0, %v2371_v59  ;;  %v849_v42 = vadd.f32 %v848_v58, %v3149_v55  ;;  %v1162_v49 = vmul.f32 %v1098_v46, %v906_v60 }
 0x25a   : > { %v978_v39 = vmul.f32 0.70710677, %v847_v48  ;;  %v1163_v7 = vmul.f32 %v1099_v63, %v907_v62  ;;  %v851_v47 = vadd.f32 %v850_v1, %v3151_v56  ;;  %v913_v13 = vmul.f32 0.5, %v845_v40  ;;  %v1174_v40 = vld [vmem:[#allocation2 + $0x8] sm:$0xff]  ;;  %v1175_v62 = vld [vmem:[#allocation2 + $0x10] sm:$0xff] }
 0x25b   : > { %2380 = verf.f32 %v977_v0  ;;  %v1164_v4 = vmul.f32 %v1100_v3, %v908_v2  ;;  %v979_v50 = vmul.f32 0.70710677, %v849_v42  ;;  %v915_v23 = vmul.f32 0.5, %v849_v42  ;;  %v1176_v2 = vld [vmem:[#allocation2 + $0x18] sm:$0xff] }
 0x25c   : > { %2382 = verf.f32 %v978_v39  ;;  %v980_v53 = vmul.f32 0.70710677, %v851_v47  ;;  %v1231_v52 = vpack.c.bf16 %v1163_v7, %v1161_v5  ;;  %v914_v18 = vmul.f32 0.5, %v847_v48 }
 0x25d   : > { %v2373_v45 = vpop.eup %2372  ;;  %2384 = verf.f32 %v979_v50  ;;  %v1232_v54 = vpack.c.bf16 %v1164_v4, %v1162_v49  ;;  %v916_v17 = vmul.f32 0.5, %v851_v47  ;;  %v1177_v47 = vld [vmem:[#allocation2 + $0x20] sm:$0xff] }
 0x25e   : > { %v2375_v61 = vpop.eup %2374  ;;  %v1101_v51 = vadd.f32 1.0, %v2373_v45  ;;  %2386 = verf.f32 %v980_v53  ;;  %v1178_v45 = vld [vmem:[#allocation2 + $0x28] sm:$0xff] }
 0x25f   : > { %v2377_v6 = vpop.eup %2376  ;;  %v1102_v57 = vadd.f32 1.0, %v2375_v61  ;;  %1501 = vmatprep.mubr.bf16.mxu1 %v1232_v54 }
 0x260   : > { %v2379_v55 = vpop.eup %2378  ;;  %v1103_v56 = vadd.f32 1.0, %v2377_v6  ;;  %1502 = vmatmul.mubr.bf16.gmra.mrb[52].mxu1 %v1231_v52  ;;  %v1165_v25 = vmul.f32 %v1101_v51, %v909_v10  ;;  %v1179_v6 = vld [vmem:[#allocation2 + $0x30] sm:$0xff] }
 0x261   : > { %v1104_v16 = vadd.f32 1.0, %v2379_v55  ;;  %v1166_v27 = vmul.f32 %v1102_v57, %v910_v8 }
 0x262   : > { %v1167_v26 = vmul.f32 %v1103_v56, %v911_v12  ;;  %v1180_v12 = vld [vmem:[#allocation2 + $0x38] sm:$0xff] }
 0x263   : > { %v1168_v30 = vmul.f32 %v1104_v16, %v912_v14 }
 0x264   : > { %v1233_v32 = vpack.c.bf16 %v1167_v26, %v1165_v25  ;;  %v1181_v26 = vld [vmem:[#allocation2 + $0x40] sm:$0xff] }
 0x265   : > { %v2381_v31 = vpop.eup %2380  ;;  %v1234_v35 = vpack.c.bf16 %v1168_v30, %v1166_v27 }
 0x266   : > { %v2383_v34 = vpop.eup %2382  ;;  %v1105_v36 = vadd.f32 1.0, %v2381_v31 }
 0x267   : > { %v2385_v11 = vpop.eup %2384  ;;  %v1106_v38 = vadd.f32 1.0, %v2383_v34  ;;  %1509 = vmatprep.mubr.bf16.mxu1 %v1234_v35 }
 0x268   : > { %v2387_v9 = vpop.eup %2386  ;;  %v1107_v19 = vadd.f32 1.0, %v2385_v11  ;;  %1510 = vmatmul.mubr.bf16.gmra.mrb[56].mxu1 %v1233_v32  ;;  %v1169_v15 = vmul.f32 %v1105_v36, %v913_v13  ;;  %v1182_v32 = vld [vmem:[#allocation2 + $0x48] sm:$0xff] }
 0x269   : > { %v1108_v37 = vadd.f32 1.0, %v2387_v9  ;;  %v1170_v29 = vmul.f32 %v1106_v38, %v914_v18  ;;  %v1183_v9 = vld [vmem:[#allocation2 + $0x50] sm:$0xff]  ;;  %v1184_v18 = vld [vmem:[#allocation2 + $0x58] sm:$0xff] }
 0x26a   : > { %v1171_v21 = vmul.f32 %v1107_v19, %v915_v23 }
 0x26b   : > { %v1172_v22 = vmul.f32 %v1108_v37, %v916_v17 }
 0x26c   : > { %v1235_v33 = vpack.c.bf16 %v1171_v21, %v1169_v15 }
 0x26d   : > { %v1236_v20 = vpack.c.bf16 %v1172_v22, %v1170_v29  ;;  %v1185_v22 = vld [vmem:[#allocation2 + $0x60] sm:$0xff] }
 0x26f   : > { %1517 = vmatprep.mubr.bf16.mxu1 %v1236_v20 }
 0x270   : > { %1518 = vmatmul.mubr.bf16.gmra.mrb[60].mxu1 %v1235_v33 }
 0x2cb   : > { %v1971_v24 = vpop.f32.mrb[0].mxu1 }
 0x2cc   : > { %v1972_v28 = vpop.f32.mrb[1].mxu1 }
 0x2cd   : > { %v1973_v43 = vadd.f32 %v1972_v28, %v1971_v24  ;;  %v1974_v44 = vpop.f32.mrb[2].mxu1 }
 0x2ce   : > { %v1975_v46 = vpop.f32.mrb[3].mxu1 }
 0x2cf   : > { %v1526_v58 = vadd.f32 %v1973_v43, %v1173_v41  ;;  %v1976_v59 = vadd.f32 %v1975_v46, %v1974_v44  ;;  %v1186_v41 = vld [vmem:[#allocation2 + $0x68] sm:$0xff] }
 0x2d1   : > { %1558 = vst [vmem:[#allocation2] sm:$0xff] %v1526_v58  ;;  %v1527_v48 = vadd.f32 %v1976_v59, %v1174_v40  ;;  %v1187_v58 = vld [vmem:[#allocation2 + $0x70] sm:$0xff] }
 0x2d3   : > { %1559 = vst [vmem:[#allocation2 + $0x8] sm:$0xff] %v1527_v48  ;;  %v1977_v60 = vpop.f32.mrb[4].mxu1 }
 0x2d4   : > { %v1978_v63 = vpop.f32.mrb[5].mxu1 }
 0x2d5   : > { %v1979_v0 = vadd.f32 %v1978_v63, %v1977_v60  ;;  %v1980_v1 = vpop.f32.mrb[6].mxu1 }
 0x2d6   : > { %v1981_v3 = vpop.f32.mrb[7].mxu1 }
 0x2d7   : > { %v1528_v39 = vadd.f32 %v1979_v0, %v1175_v62  ;;  %v1982_v42 = vadd.f32 %v1981_v3, %v1980_v1  ;;  %v1188_v62 = vld [vmem:[#allocation2 + $0x78] sm:$0xff] }
 0x2d9   : > { %1560 = vst [vmem:[#allocation2 + $0x10] sm:$0xff] %v1528_v39  ;;  %v1529_v5 = vadd.f32 %v1982_v42, %v1176_v2  ;;  %v1189_v39 = vld [vmem:[#allocation2 + $0x80] sm:$0xff] }
 0x2db   : > { %1561 = vst [vmem:[#allocation2 + $0x18] sm:$0xff] %v1529_v5  ;;  %v1983_v7 = vpop.f32.mrb[8].mxu1 }
 0x2dc   : > { %v1984_v49 = vpop.f32.mrb[9].mxu1 }
 0x2dd   : > { %v1985_v4 = vadd.f32 %v1984_v49, %v1983_v7  ;;  %v1986_v50 = vpop.f32.mrb[10].mxu1 }
 0x2de   : > { %v1987_v53 = vpop.f32.mrb[11].mxu1 }
 0x2df   : > { %v1530_v52 = vadd.f32 %v1985_v4, %v1177_v47  ;;  %v1988_v61 = vadd.f32 %v1987_v53, %v1986_v50  ;;  %v1190_v47 = vld [vmem:[#allocation2 + $0x88] sm:$0xff] }
 0x2e1   : > { %1562 = vst [vmem:[#allocation2 + $0x20] sm:$0xff] %v1530_v52  ;;  %v1531_v54 = vadd.f32 %v1988_v61, %v1178_v45  ;;  %v1191_v52 = vld [vmem:[#allocation2 + $0x90] sm:$0xff] }
 0x2e3   : > { %1563 = vst [vmem:[#allocation2 + $0x28] sm:$0xff] %v1531_v54  ;;  %v1989_v51 = vpop.f32.mrb[12].mxu1 }
 0x2e4   : > { %v1990_v57 = vpop.f32.mrb[13].mxu1 }
 0x2e5   : > { %v1991_v55 = vadd.f32 %v1990_v57, %v1989_v51  ;;  %v1992_v10 = vpop.f32.mrb[14].mxu1 }
 0x2e6   : > { %v1993_v56 = vpop.f32.mrb[15].mxu1 }
 0x2e7   : > { %v1532_v8 = vadd.f32 %v1991_v55, %v1179_v6  ;;  %v1994_v14 = vadd.f32 %v1993_v56, %v1992_v10  ;;  %v1192_v6 = vld [vmem:[#allocation2 + $0x98] sm:$0xff] }
 0x2e9   : > { %1564 = vst [vmem:[#allocation2 + $0x30] sm:$0xff] %v1532_v8  ;;  %v1533_v16 = vadd.f32 %v1994_v14, %v1180_v12  ;;  %v1193_v8 = vld [vmem:[#allocation2 + $0xa0] sm:$0xff] }
 0x2eb   : > { %1565 = vst [vmem:[#allocation2 + $0x38] sm:$0xff] %v1533_v16  ;;  %v1995_v25 = vpop.f32.mrb[16].mxu1 }
 0x2ec   : > { %v1996_v27 = vpop.f32.mrb[17].mxu1 }
 0x2ed   : > { %v1997_v30 = vadd.f32 %v1996_v27, %v1995_v25  ;;  %v1998_v31 = vpop.f32.mrb[18].mxu1 }
 0x2ee   : > { %v1999_v34 = vpop.f32.mrb[19].mxu1 }
 0x2ef   : > { %v1534_v35 = vadd.f32 %v1997_v30, %v1181_v26  ;;  %v2000_v36 = vadd.f32 %v1999_v34, %v1998_v31  ;;  %v1194_v26 = vld [vmem:[#allocation2 + $0xa8] sm:$0xff] }
 0x2f1   : > { %1566 = vst [vmem:[#allocation2 + $0x40] sm:$0xff] %v1534_v35  ;;  %v1535_v11 = vadd.f32 %v2000_v36, %v1182_v32  ;;  %v1195_v35 = vld [vmem:[#allocation2 + $0xb0] sm:$0xff] }
 0x2f3   : > { %1567 = vst [vmem:[#allocation2 + $0x48] sm:$0xff] %v1535_v11  ;;  %v2001_v38 = vpop.f32.mrb[20].mxu1 }
 0x2f4   : > { %v2002_v13 = vpop.f32.mrb[21].mxu1 }
 0x2f5   : > { %v2003_v23 = vadd.f32 %v2002_v13, %v2001_v38  ;;  %v2004_v19 = vpop.f32.mrb[22].mxu1 }
 0x2f6   : > { %v2005_v17 = vpop.f32.mrb[23].mxu1 }
 0x2f7   : > { %v1536_v37 = vadd.f32 %v2003_v23, %v1183_v9  ;;  %v2006_v15 = vadd.f32 %v2005_v17, %v2004_v19  ;;  %v1196_v9 = vld [vmem:[#allocation2 + $0xb8] sm:$0xff] }
 0x2f9   : > { %1568 = vst [vmem:[#allocation2 + $0x50] sm:$0xff] %v1536_v37  ;;  %v1537_v21 = vadd.f32 %v2006_v15, %v1184_v18  ;;  %v1197_v37 = vld [vmem:[#allocation2 + $0xc0] sm:$0xff] }
 0x2fb   : > { %1569 = vst [vmem:[#allocation2 + $0x58] sm:$0xff] %v1537_v21  ;;  %v2007_v29 = vpop.f32.mrb[24].mxu1 }
 0x2fc   : > { %v2008_v33 = vpop.f32.mrb[25].mxu1 }
 0x2fd   : > { %v2009_v20 = vadd.f32 %v2008_v33, %v2007_v29  ;;  %v2010_v24 = vpop.f32.mrb[26].mxu1 }
 0x2fe   : > { %v2011_v28 = vpop.f32.mrb[27].mxu1 }
 0x2ff   : > { %v1538_v43 = vadd.f32 %v2009_v20, %v1185_v22  ;;  %v2012_v44 = vadd.f32 %v2011_v28, %v2010_v24  ;;  %v1198_v22 = vld [vmem:[#allocation2 + $0xc8] sm:$0xff] }
 0x301   : > { %1570 = vst [vmem:[#allocation2 + $0x60] sm:$0xff] %v1538_v43  ;;  %v1539_v40 = vadd.f32 %v2012_v44, %v1186_v41  ;;  %v1199_v43 = vld [vmem:[#allocation2 + $0xd0] sm:$0xff] }
 0x303   : > { %1571 = vst [vmem:[#allocation2 + $0x68] sm:$0xff] %v1539_v40  ;;  %v2013_v46 = vpop.f32.mrb[28].mxu1 }
 0x304   : > { %v2014_v59 = vpop.f32.mrb[29].mxu1 }
 0x305   : > { %v2015_v48 = vadd.f32 %v2014_v59, %v2013_v46  ;;  %v2016_v60 = vpop.f32.mrb[30].mxu1 }
 0x306   : > { %v2017_v63 = vpop.f32.mrb[31].mxu1 }
 0x307   : > { %v1540_v0 = vadd.f32 %v2015_v48, %v1187_v58  ;;  %v2018_v1 = vadd.f32 %v2017_v63, %v2016_v60  ;;  %v1200_v58 = vld [vmem:[#allocation2 + $0xd8] sm:$0xff] }
 0x309   : > { %1572 = vst [vmem:[#allocation2 + $0x70] sm:$0xff] %v1540_v0  ;;  %v1541_v2 = vadd.f32 %v2018_v1, %v1188_v62  ;;  %v1201_v0 = vld [vmem:[#allocation2 + $0xe0] sm:$0xff] }
 0x30b   : > { %1573 = vst [vmem:[#allocation2 + $0x78] sm:$0xff] %v1541_v2  ;;  %v2019_v3 = vpop.f32.mrb[32].mxu1 }
 0x30c   : > { %v2020_v42 = vpop.f32.mrb[33].mxu1 }
 0x30d   : > { %v2021_v5 = vadd.f32 %v2020_v42, %v2019_v3  ;;  %v2022_v7 = vpop.f32.mrb[34].mxu1 }
 0x30e   : > { %v2023_v49 = vpop.f32.mrb[35].mxu1 }
 0x30f   : > { %v1542_v4 = vadd.f32 %v2021_v5, %v1189_v39  ;;  %v2024_v50 = vadd.f32 %v2023_v49, %v2022_v7  ;;  %v1202_v39 = vld [vmem:[#allocation2 + $0xe8] sm:$0xff] }
 0x311   : > { %1574 = vst [vmem:[#allocation2 + $0x80] sm:$0xff] %v1542_v4  ;;  %v1543_v45 = vadd.f32 %v2024_v50, %v1190_v47  ;;  %v1203_v4 = vld [vmem:[#allocation2 + $0xf0] sm:$0xff] }
 0x313   : > { %1575 = vst [vmem:[#allocation2 + $0x88] sm:$0xff] %v1543_v45  ;;  %v2025_v53 = vpop.f32.mrb[36].mxu1 }
 0x314   : > { %v2026_v61 = vpop.f32.mrb[37].mxu1 }
 0x315   : > { %v2027_v54 = vadd.f32 %v2026_v61, %v2025_v53  ;;  %v2028_v51 = vpop.f32.mrb[38].mxu1 }
 0x316   : > { %v2029_v57 = vpop.f32.mrb[39].mxu1 }
 0x317   : > { %v1544_v55 = vadd.f32 %v2027_v54, %v1191_v52  ;;  %v2030_v10 = vadd.f32 %v2029_v57, %v2028_v51  ;;  %v1204_v52 = vld [vmem:[#allocation2 + $0xf8] sm:$0xff]  ;;  %v1594_v57 = vld [vmem:[#allocation2] sm:$0xff] (!%p1943_p9) }
 0x319   : > { %1576 = vst [vmem:[#allocation2 + $0x90] sm:$0xff] %v1544_v55  ;;  %v1545_v12 = vadd.f32 %v2030_v10, %v1192_v6  ;;  %v3402_v55 = vld [vmem:[#allocation11] ss:$0 sm:$0xff] (!%p1943_p9)  ;;  %v1595_v10 = vld [vmem:[#allocation2 + $0x8] sm:$0xff] (!%p1943_p9) }
 0x31b   : > { %1577 = vst [vmem:[#allocation2 + $0x98] sm:$0xff] %v1545_v12  ;;  %v2031_v56 = vpop.f32.mrb[40].mxu1  ;;  %v1633_v12 = vadd.f32 (!%p1943_p9), %v3402_v55, %v1594_v57 }
 0x31c   : > { %v2032_v14 = vpop.f32.mrb[41].mxu1 }
 0x31d   : > { %v2033_v16 = vadd.f32 %v2032_v14, %v2031_v56  ;;  %v2034_v25 = vpop.f32.mrb[42].mxu1  ;;  %v1634_v56 = vadd.f32 (!%p1943_p9), %v3402_v55, %v1595_v10  ;;  %v1597_v14 = vld [vmem:[#allocation2 + $0x18] sm:$0xff] (!%p1943_p9)  ;;  %1665 = vst [vmem:[%s3080_s1] sm:$0xff] (!%p1943_p9), %v1633_v12 }
 0x31e   : > { %v2035_v27 = vpop.f32.mrb[43].mxu1 }
 0x31f   : > { %v1546_v30 = vadd.f32 %v2033_v16, %v1193_v8  ;;  %v2036_v31 = vadd.f32 %v2035_v27, %v2034_v25  ;;  %v1596_v8 = vld [vmem:[#allocation2 + $0x10] sm:$0xff] (!%p1943_p9)  ;;  %v1598_v16 = vld [vmem:[#allocation2 + $0x20] sm:$0xff] (!%p1943_p9)  ;;  %1666 = vst [vmem:[%s3080_s1 + $0x8] sm:$0xff] (!%p1943_p9), %v1634_v56 }
 0x320   : > { %v1635_v25 = vadd.f32 (!%p1943_p9), %v3402_v55, %v1596_v8  ;;  %v1637_v27 = vadd.f32 (!%p1943_p9), %v3402_v55, %v1598_v16 }
 0x321   : > { %1578 = vst [vmem:[#allocation2 + $0xa0] sm:$0xff] %v1546_v30  ;;  %v1547_v32 = vadd.f32 %v2036_v31, %v1194_v26  ;;  %v1636_v26 = vadd.f32 (!%p1943_p9), %v3402_v55, %v1597_v14  ;;  %v1599_v30 = vld [vmem:[#allocation2 + $0x28] sm:$0xff] (!%p1943_p9)  ;;  %v1600_v31 = vld [vmem:[#allocation2 + $0x30] sm:$0xff] (!%p1943_p9) }
 0x322   : > { %1667 = vst [vmem:[%s3080_s1 + $0x10] sm:$0xff] (!%p1943_p9), %v1635_v25  ;;  %1669 = vst [vmem:[%s3080_s1 + $0x20] sm:$0xff] (!%p1943_p9), %v1637_v27 }
 0x323   : > { %1579 = vst [vmem:[#allocation2 + $0xa8] sm:$0xff] %v1547_v32  ;;  %v2037_v34 = vpop.f32.mrb[44].mxu1  ;;  %v1601_v32 = vld [vmem:[#allocation2 + $0x38] sm:$0xff] (!%p1943_p9)  ;;  %1668 = vst [vmem:[%s3080_s1 + $0x18] sm:$0xff] (!%p1943_p9), %v1636_v26 }
 0x324   : > { %v2038_v36 = vpop.f32.mrb[45].mxu1 }
 0x325   : > { %v2039_v11 = vadd.f32 %v2038_v36, %v2037_v34  ;;  %v2040_v38 = vpop.f32.mrb[46].mxu1  ;;  %v1638_v34 = vadd.f32 (!%p1943_p9), %v3402_v55, %v1599_v30  ;;  %v1640_v36 = vadd.f32 (!%p1943_p9), %v3402_v55, %v1601_v32 }
 0x326   : > { %v2041_v13 = vpop.f32.mrb[47].mxu1 }
 0x327   : > { %v1548_v23 = vadd.f32 %v2039_v11, %v1195_v35  ;;  %v2042_v19 = vadd.f32 %v2041_v13, %v2040_v38  ;;  %v1639_v35 = vadd.f32 (!%p1943_p9), %v3402_v55, %v1600_v31  ;;  %v1602_v11 = vld [vmem:[#allocation2 + $0x40] sm:$0xff] (!%p1943_p9)  ;;  %v1603_v38 = vld [vmem:[#allocation2 + $0x48] sm:$0xff] (!%p1943_p9)  ;;  %1670 = vst [vmem:[%s3080_s1 + $0x28] sm:$0xff] (!%p1943_p9), %v1638_v34  ;;  %1672 = vst [vmem:[%s3080_s1 + $0x38] sm:$0xff] (!%p1943_p9), %v1640_v36 }
 0x328   : > { %v1641_v13 = vadd.f32 (!%p1943_p9), %v3402_v55, %v1602_v11 }
 0x329   : > { %1580 = vst [vmem:[#allocation2 + $0xb0] sm:$0xff] %v1548_v23  ;;  %v1549_v18 = vadd.f32 %v2042_v19, %v1196_v9  ;;  %v1604_v9 = vld [vmem:[#allocation2 + $0x50] sm:$0xff] (!%p1943_p9)  ;;  %v1642_v23 = vadd.f32 (!%p1943_p9), %v3402_v55, %v1603_v38  ;;  %1671 = vst [vmem:[%s3080_s1 + $0x30] sm:$0xff] (!%p1943_p9), %v1639_v35 }
 0x32a   : > { %v1643_v19 = vadd.f32 (!%p1943_p9), %v3402_v55, %v1604_v9  ;;  %1673 = vst [vmem:[%s3080_s1 + $0x40] sm:$0xff] (!%p1943_p9), %v1641_v13 }
 0x32b   : > { %1581 = vst [vmem:[#allocation2 + $0xb8] sm:$0xff] %v1549_v18  ;;  %v2043_v17 = vpop.f32.mrb[48].mxu1  ;;  %v1605_v18 = vld [vmem:[#allocation2 + $0x58] sm:$0xff] (!%p1943_p9)  ;;  %1674 = vst [vmem:[%s3080_s1 + $0x48] sm:$0xff] (!%p1943_p9), %v1642_v23 }
 0x32c   : > { %v2044_v15 = vpop.f32.mrb[49].mxu1  ;;  %1675 = vst [vmem:[%s3080_s1 + $0x50] sm:$0xff] (!%p1943_p9), %v1643_v19 }
 0x32d   : > { %v2045_v21 = vadd.f32 %v2044_v15, %v2043_v17  ;;  %v2046_v29 = vpop.f32.mrb[50].mxu1  ;;  %v1606_v17 = vld [vmem:[#allocation2 + $0x60] sm:$0xff] (!%p1943_p9)  ;;  %v1644_v15 = vadd.f32 (!%p1943_p9), %v3402_v55, %v1605_v18 }
 0x32e   : > { %v2047_v33 = vpop.f32.mrb[51].mxu1 }
 0x32f   : > { %v1550_v20 = vadd.f32 %v2045_v21, %v1197_v37  ;;  %v2048_v24 = vadd.f32 %v2047_v33, %v2046_v29  ;;  %v1607_v37 = vld [vmem:[#allocation2 + $0x68] sm:$0xff] (!%p1943_p9)  ;;  %v1645_v21 = vadd.f32 (!%p1943_p9), %v3402_v55, %v1606_v17  ;;  %v1609_v33 = vld [vmem:[#allocation2 + $0x78] sm:$0xff] (!%p1943_p9)  ;;  %1676 = vst [vmem:[%s3080_s1 + $0x58] sm:$0xff] (!%p1943_p9), %v1644_v15 }
 0x330   : > { %v1646_v29 = vadd.f32 (!%p1943_p9), %v3402_v55, %v1607_v37 }
 0x331   : > { %1582 = vst [vmem:[#allocation2 + $0xc0] sm:$0xff] %v1550_v20  ;;  %v1551_v41 = vadd.f32 %v2048_v24, %v1198_v22  ;;  %v1608_v22 = vld [vmem:[#allocation2 + $0x70] sm:$0xff] (!%p1943_p9)  ;;  %v1610_v20 = vld [vmem:[#allocation2 + $0x80] sm:$0xff] (!%p1943_p9)  ;;  %1677 = vst [vmem:[%s3080_s1 + $0x60] sm:$0xff] (!%p1943_p9), %v1645_v21 }
 0x332   : > { %v1647_v24 = vadd.f32 (!%p1943_p9), %v3402_v55, %v1608_v22  ;;  %1678 = vst [vmem:[%s3080_s1 + $0x68] sm:$0xff] (!%p1943_p9), %v1646_v29 }
 0x333   : > { %1583 = vst [vmem:[#allocation2 + $0xc8] sm:$0xff] %v1551_v41  ;;  %v2049_v28 = vpop.f32.mrb[52].mxu1  ;;  %v1648_v41 = vadd.f32 (!%p1943_p9), %v3402_v55, %v1609_v33 }
 0x334   : > { %v2050_v44 = vpop.f32.mrb[53].mxu1  ;;  %1679 = vst [vmem:[%s3080_s1 + $0x70] sm:$0xff] (!%p1943_p9), %v1647_v24 }
 0x335   : > { %v2051_v40 = vadd.f32 %v2050_v44, %v2049_v28  ;;  %v2052_v46 = vpop.f32.mrb[54].mxu1  ;;  %v1649_v28 = vadd.f32 (!%p1943_p9), %v3402_v55, %v1610_v20  ;;  %v1612_v44 = vld [vmem:[#allocation2 + $0x90] sm:$0xff] (!%p1943_p9)  ;;  %1680 = vst [vmem:[%s3080_s1 + $0x78] sm:$0xff] (!%p1943_p9), %v1648_v41 }
 0x336   : > { %v2053_v59 = vpop.f32.mrb[55].mxu1 }
 0x337   : > { %v1552_v48 = vadd.f32 %v2051_v40, %v1199_v43  ;;  %v2054_v60 = vadd.f32 %v2053_v59, %v2052_v46  ;;  %v1611_v43 = vld [vmem:[#allocation2 + $0x88] sm:$0xff] (!%p1943_p9)  ;;  %v1613_v40 = vld [vmem:[#allocation2 + $0x98] sm:$0xff] (!%p1943_p9)  ;;  %1681 = vst [vmem:[%s3080_s1 + $0x80] sm:$0xff] (!%p1943_p9), %v1649_v28 }
 0x338   : > { %v1650_v46 = vadd.f32 (!%p1943_p9), %v3402_v55, %v1611_v43  ;;  %v1652_v59 = vadd.f32 (!%p1943_p9), %v3402_v55, %v1613_v40 }
 0x339   : > { %1584 = vst [vmem:[#allocation2 + $0xd0] sm:$0xff] %v1552_v48  ;;  %v1553_v62 = vadd.f32 %v2054_v60, %v1200_v58  ;;  %v1651_v58 = vadd.f32 (!%p1943_p9), %v3402_v55, %v1612_v44  ;;  %v1614_v48 = vld [vmem:[#allocation2 + $0xa0] sm:$0xff] (!%p1943_p9)  ;;  %v1615_v60 = vld [vmem:[#allocation2 + $0xa8] sm:$0xff] (!%p1943_p9) }
 0x33a   : > { %1682 = vst [vmem:[%s3080_s1 + $0x88] sm:$0xff] (!%p1943_p9), %v1650_v46  ;;  %1684 = vst [vmem:[%s3080_s1 + $0x98] sm:$0xff] (!%p1943_p9), %v1652_v59 }
 0x33b   : > { %1585 = vst [vmem:[#allocation2 + $0xd8] sm:$0xff] %v1553_v62  ;;  %v2055_v63 = vpop.f32.mrb[56].mxu1  ;;  %v1616_v62 = vld [vmem:[#allocation2 + $0xb0] sm:$0xff] (!%p1943_p9)  ;;  %1683 = vst [vmem:[%s3080_s1 + $0x90] sm:$0xff] (!%p1943_p9), %v1651_v58 }
 0x33c   : > { %v2056_v1 = vpop.f32.mrb[57].mxu1 }
 0x33d   : > { %v2057_v2 = vadd.f32 %v2056_v1, %v2055_v63  ;;  %v2058_v3 = vpop.f32.mrb[58].mxu1  ;;  %v1653_v63 = vadd.f32 (!%p1943_p9), %v3402_v55, %v1614_v48  ;;  %v1655_v1 = vadd.f32 (!%p1943_p9), %v3402_v55, %v1616_v62 }
 0x33e   : > { %v2059_v42 = vpop.f32.mrb[59].mxu1 }
 0x33f   : > { %v1554_v5 = vadd.f32 %v2057_v2, %v1201_v0  ;;  %v2060_v7 = vadd.f32 %v2059_v42, %v2058_v3  ;;  %v1654_v0 = vadd.f32 (!%p1943_p9), %v3402_v55, %v1615_v60  ;;  %v1617_v2 = vld [vmem:[#allocation2 + $0xb8] sm:$0xff] (!%p1943_p9)  ;;  %v1618_v3 = vld [vmem:[#allocation2 + $0xc0] sm:$0xff] (!%p1943_p9)  ;;  %1685 = vst [vmem:[%s3080_s1 + $0xa0] sm:$0xff] (!%p1943_p9), %v1653_v63  ;;  %1687 = vst [vmem:[%s3080_s1 + $0xb0] sm:$0xff] (!%p1943_p9), %v1655_v1 }
 0x340   : > { %v1656_v42 = vadd.f32 (!%p1943_p9), %v3402_v55, %v1617_v2 }
 0x341   : > { %1586 = vst [vmem:[#allocation2 + $0xe0] sm:$0xff] %v1554_v5  ;;  %v1555_v47 = vadd.f32 %v2060_v7, %v1202_v39  ;;  %v1619_v39 = vld [vmem:[#allocation2 + $0xc8] sm:$0xff] (!%p1943_p9)  ;;  %v1657_v5 = vadd.f32 (!%p1943_p9), %v3402_v55, %v1618_v3  ;;  %1686 = vst [vmem:[%s3080_s1 + $0xa8] sm:$0xff] (!%p1943_p9), %v1654_v0 }
 0x342   : > { %v1658_v7 = vadd.f32 (!%p1943_p9), %v3402_v55, %v1619_v39  ;;  %1688 = vst [vmem:[%s3080_s1 + $0xb8] sm:$0xff] (!%p1943_p9), %v1656_v42 }
 0x343   : > { %1587 = vst [vmem:[#allocation2 + $0xe8] sm:$0xff] %v1555_v47  ;;  %v2061_v49 = vpop.f32.mrb[60].mxu1  ;;  %v1620_v47 = vld [vmem:[#allocation2 + $0xd0] sm:$0xff] (!%p1943_p9)  ;;  %1689 = vst [vmem:[%s3080_s1 + $0xc0] sm:$0xff] (!%p1943_p9), %v1657_v5 }
 0x344   : > { %v2062_v50 = vpop.f32.mrb[61].mxu1  ;;  %1690 = vst [vmem:[%s3080_s1 + $0xc8] sm:$0xff] (!%p1943_p9), %v1658_v7 }
 0x345   : > { %v2063_v45 = vadd.f32 %v2062_v50, %v2061_v49  ;;  %v2064_v53 = vpop.f32.mrb[62].mxu1  ;;  %1593 = sbr.rel (%p1943_p9) target bundleno = 854 (0x356), region = 68  ;;  %v1621_v49 = vld [vmem:[#allocation2 + $0xd8] sm:$0xff] (!%p1943_p9)  ;;  %v1659_v50 = vadd.f32 (!%p1943_p9), %v3402_v55, %v1620_v47 }
 0x346   : > { %v2065_v61 = vpop.f32.mrb[63].mxu1 }
 0x347   : > { %v1556_v54 = vadd.f32 %v2063_v45, %v1203_v4  ;;  %v2066_v51 = vadd.f32 %v2065_v61, %v2064_v53  ;;  %v1660_v45 = vadd.f32 (!%p1943_p9), %v3402_v55, %v1621_v49  ;;  %1691 = vst [vmem:[%s3080_s1 + $0xd0] sm:$0xff] (!%p1943_p9), %v1659_v50 }
 0x348   : > { %v1622_v4 = vld [vmem:[#allocation2 + $0xe0] sm:$0xff] (!%p1943_p9) }
 0x349   : > { %1588 = vst [vmem:[#allocation2 + $0xf0] sm:$0xff] %v1556_v54  ;;  %v1557_v6 = vadd.f32 %v2066_v51, %v1204_v52  ;;  %v1661_v53 = vadd.f32 (!%p1943_p9), %v3402_v55, %v1622_v4  ;;  %1692 = vst [vmem:[%s3080_s1 + $0xd8] sm:$0xff] (!%p1943_p9), %v1660_v45 }
 0x34a   : > { %v1623_v52 = vld [vmem:[#allocation2 + $0xe8] sm:$0xff] (!%p1943_p9) }
 0x34b   : > { %1589 = vst [vmem:[#allocation2 + $0xf8] sm:$0xff] %v1557_v6  ;;  %v1662_v51 = vadd.f32 (!%p1943_p9), %v3402_v55, %v1623_v52  ;;  %1693 = vst [vmem:[%s3080_s1 + $0xe0] sm:$0xff] (!%p1943_p9), %v1661_v53 }
 0x34d   : > { %1694 = vst [vmem:[%s3080_s1 + $0xe8] sm:$0xff] %v1662_v51 }
 0x350   : > { %v1624_v61 = vld [vmem:[#allocation2 + $0xf0] sm:$0xff] }
 0x351   : > { %v1663_v6 = vadd.f32 %v3402_v55, %v1624_v61 }
 0x352   : > { %v1625_v54 = vld [vmem:[#allocation2 + $0xf8] sm:$0xff] }
 0x353   : > { %v1664_v57 = vadd.f32 %v3402_v55, %v1625_v54  ;;  %1695 = vst [vmem:[%s3080_s1 + $0xf0] sm:$0xff] %v1663_v6 }
 0x355   : > { %1696 = vst [vmem:[%s3080_s1 + $0xf8] sm:$0xff] %v1664_v57 }
 0x356 PF: > { %s3607_s24 = sld [smem:[#allocation20_spill]]  ;;  %s3608_s25 = sld [smem:[#allocation23_spill]] }
 0x357   : > { %s3609_s27 = sld [smem:[#allocation30_spill]]  ;;  %s1711_s10 = sshll.u32 %s3080_s1, 4  ;;  %s3475_s10 = int_to_ptr.vmem [resolvable:$true] %s1711_s10 }
 0x358   : > { %s1698_s8 = scalar_lea.sflag [#allocation5], %s3048_s13  ;;  %s2536_s16 = scalar_lea.vmem %s3475_s10, 4096 }
 0x359   : > { %p2537_p4 = scmp.ne.s32.totalorder %s3475_s10, %s2536_s16  ;;  %s2684_s6 = smov [#allocation12]  }
 0x35a   : > { %s2540_s12 = sshll.u32 %s2684_s6, 4  ;;  %s2541_s12 = int_to_ptr.vmem [resolvable:$false] %s2540_s12 }
 0x35b   : > { %s2542_s9 = scalar_lea.vmem %s2541_s12, 8192  ;;  %p2543_p11 = scmp.lt.s32.totalorder %s3475_s10, %s2541_s12 }
 0x35c   : > { %s1954_s18 = sshll.u32 %s3607_s24, 12  ;;  %p3611_p3 = scmp.ne.s32.totalorder %s3608_s25, 0 }
 0x35d   : > { %s3610_s30 = smov %s3609_s27  ;;  %s3472_s14 = scalar_lea.hbm %s3609_s27, %s1954_s18 }
 0x35e   : > { %p2538_p1 = pnand %p2537_p4, %p3611_p3  ;;  %p2544_p5 = scmp.lt.s32.totalorder %s2542_s9, %s2536_s16 }
 0x360   : > { %p2539_p0 = pneg %p2538_p1  ;;  %p2545_p8 = por %p2544_p5, %p2543_p11 }
 0x362   : > { %p2546_p6 = pnand %p2545_p8, %p2539_p0 }
 0x364   : > { %2549 = shalt.err (!%p2546_p6)
}
 0x365   : > { %s2550_s15 = scalar_lea.hbm %s3472_s14, 4096  ;;  %s2554_s1 = scalar_lea.hbm %s3610_s30, 8192 }
 0x366   : > { %p2551_p13 = scmp.ne.s32.totalorder %s3472_s14, %s2550_s15  ;;  %p2555_p7 = scmp.lt.u32.totalorder %s3472_s14, %s3610_s30 }
 0x367   : > { %p2556_p12 = scmp.lt.u32.totalorder %s2554_s1, %s2550_s15  ;;  %p2558_p4 = scmp.lt.u32.totalorder %s2550_s15, %s3472_s14 }
 0x368   : > { %p2552_p2 = pnand %p2551_p13, %p3611_p3 }
 0x369   : > { %p2557_p9 = por %p2556_p12, %p2555_p7 }
 0x36a   : > { %p2553_p10 = pneg %p2552_p2 }
 0x36b   : > { %p2559_p1 = por %p2558_p4, %p2557_p9 }
 0x36d   : > { %p2560_p0 = pnand %p2559_p1, %p2553_p10 }
 0x36f   : > { %2563 = shalt.err (!%p2560_p0)
}
 0x370   : > { %s2685_s24 = smov 128   ;;  %s2686_s18 = smov 8  }
 0x371   : > { %2079 = dma.vmem_to_hbm [thread:$0]  (%p3611_p3), %s3475_s10, 4096, %s3472_s14, %s1698_s8, %s2685_s24, %s2685_s24, %s2686_s18  }
 0x372 PF: > { %s3612_s0 = sld [smem:[#allocation18_spill]]  ;;  %s3613_s5 = sld [smem:[#allocation24_spill]] }
 0x373   : > { %p2105_p11 = scmp.ge.s32.totalorder %s2670_s28, 2 }
 0x378   : > { %s1726_s27 = sand.u32 1, %s3612_s0   ;;  %p3614_p5 = scmp.ne.s32.totalorder %s3613_s5, 0 }
 0x379   : > { %s1727_s16 = scalar_lea.sflag [#allocation5], %s1726_s27 }
 0x37a   : > { %p2099_p8 = pnand %p2105_p11, %p3614_p5 }
 0x37c   : > { %2625 = dma.done.wait (!%p2099_p8), %s1727_s16, 4096  }
 0x37d   : > { %2627 = vsyncadd (!%p2099_p8), %s1727_s16, 4294963200  ;;  %s27_s28 = sadd.s32 1, %s2670_s28   ;;  %s3615_s25 = sld [smem:[#allocation21_spill]] }
 0x37e   : > { %p24_p6 = scmp.ge.s32.totalorder %s27_s28, 6   ;;  %s3616_s13 = sld [smem:[#allocation25_spill]] }
 0x37f   : > { %s3617_s27 = sld [smem:[#allocation26_spill]]  ;;  %s3618_s18 = smov %s2634_s19 }
 0x380   : > { %s3619_s19 = smov %s2638_s20  ;;  %s3620_s20 = smov %s2926_s21 }
 0x381   : > { %s3621_s21 = smov %s2646_s22  ;;  %s3622_s22 = smov %s2650_s23 }
 0x382   : > { %s3623_s23 = smov %s2946_s4  ;;  %s3624_s24 = smov %s2662_s26 }
 0x383   :  { %26 = sbr.rel (!%p24_p6) target bundleno = 18 (0x12), region = 134 }
 0x384   : > { %s3625_s26 = smov %s3616_s13 }
 0x38a   :  { %1732 = vsyncpa [#allocation4], 1 }
 0x38b   :  { %1734 = vsyncpa [#allocation4 + $0x1], 1 }
 0x38c   :  { %1735 = vsyncpa [#allocation7], 1 }
 0x38d   :  { %1737 = vsyncpa [#allocation7 + $0x1], 1 }
 0x38e   :  { %1738 = vsyncpa [#allocation10], 1 }
 0x38f   :  { %1740 = vsyncpa [#allocation10 + $0x1], 1 }
 0x390   :  { %1741 = vsyncpa [#allocation5], 1 }
 0x391   :  { %1743 = vsyncpa [#allocation5 + $0x1], 1 }

</bundles_post_ra>
